<compile_context>
chip_gen: v6e
topology: v6e:2x2x1
jax: 0.10.0
libtpu: 0.0.40
codegen_flags: <defaults>
</compile_context>

<pallas_src>
import functools

import jax
import jax.numpy as jnp
from jax.experimental import pallas as pl
from jax.experimental.pallas import tpu as pltpu

INPUT_DIM = 28 * 28          # 784
LATENT_DIM = 512
OUTPUT_DIM = 10
OUTPUT_DIM_PAD = 128         # lane-dense output / w3 padding

_NEG_BIG = -1.0e30           # mask value for padded logit columns


def _round_up(x, m):
    return (x + m - 1) // m * m


def _cdiv(a, b):
    return -(-a // b)


def _choose_batch_tiling(b, block_b):
    """Pick (tb, b_pad): tb multiple of 16 (f32/bf16 sublane legality), balanced
    tiles so padding waste is < 16 rows per grid step, and >= 2 grid steps when
    there is enough work so the 'parallel' batch axis shards across v7x's 2 TCs."""
    block_b = max(16, _round_up(int(block_b), 16))
    b16 = _round_up(b, 16)
    n = max(1, _cdiv(b16, block_b))
    if n == 1 and b16 >= 512:        # enough rows to keep both TensorCores busy
        n = 2
    tb = _round_up(_cdiv(b16, n), 16)
    return tb, n * tb


def _mlp_logsoftmax_kernel(x_ref, w1_ref, w2_ref, w3_ref, o_ref):
    # Cast the f32 input tile to bf16 in-kernel (VPU); MXU runs bf16 with f32 acc.
    x = x_ref[...].astype(jnp.bfloat16)
    # Layer 1: (TB, 784) @ (784, 512)
    h = jnp.dot(x, w1_ref[...], preferred_element_type=jnp.float32)
    h = jnp.maximum(h, 0.0).astype(jnp.bfloat16)
    # Hidden layer: (TB, 512) @ (512, 512)
    h = jnp.dot(h, w2_ref[...], preferred_element_type=jnp.float32)
    h = jnp.maximum(h, 0.0).astype(jnp.bfloat16)
    # Final fc (lane-padded): (TB, 512) @ (512, 128)
    logits = jnp.dot(h, w3_ref[...], preferred_element_type=jnp.float32)

    # Mask padded class columns (>= OUTPUT_DIM) so they don't perturb the softmax.
    col = jax.lax.broadcasted_iota(jnp.int32, logits.shape, dimension=1)
    logits = jnp.where(col < OUTPUT_DIM, logits, _NEG_BIG)

    # Numerically stable log-softmax along the class (lane) dim.
    m = jnp.max(logits, axis=-1, keepdims=True)
    shifted = logits - m
    lse = jnp.log(jnp.sum(jnp.exp(shifted), axis=-1, keepdims=True))
    # Lane-dense (TB, 128) store; padded columns hold garbage, sliced off outside.
    o_ref[...] = shifted - lse


def prepare_weights(w1, w2, w3):
    """One-time weight prep (call once, reuse across forward calls):
    bf16 cast + lane-pad the final layer to 128 output columns."""
    w1p = w1.astype(jnp.bfloat16)
    w2p = w2.astype(jnp.bfloat16)
    w3p = jnp.pad(w3, ((0, 0), (0, OUTPUT_DIM_PAD - OUTPUT_DIM))).astype(jnp.bfloat16)
    return w1p, w2p, w3p
    # TODO(synk): for repeated tiny-batch serving, a cross-pallas_call VMEM-resident
    # weight future (P10) would also hide the ~1.5 MiB weight DMA; not done here.


@functools.partial(jax.jit, static_argnames=("block_b",))
def simple_expanded_dnn_forward(x, w1p, w2p, w3p, *, block_b=1024):
    """x: (B, 1, 28, 28) or (B, 784) f32.  w1p:(784,512) w2p:(512,512) w3p:(512,128)
    bf16 (from prepare_weights).  Returns (B, 10) f32 log-probs."""
    x2d = x.reshape(-1, INPUT_DIM).astype(jnp.float32)
    b = x2d.shape[0]

    tb, b_pad = _choose_batch_tiling(b, block_b)
    if b_pad != b:
        x2d = jnp.pad(x2d, ((0, b_pad - b), (0, 0)))

    grid = (b_pad // tb,)

    flops = 2 * b_pad * (INPUT_DIM * LATENT_DIM
                         + LATENT_DIM * LATENT_DIM
                         + LATENT_DIM * OUTPUT_DIM_PAD)
    bytes_accessed = (x2d.size * 4                            # f32 input
                      + (w1p.size + w2p.size + w3p.size) * 2  # bf16 weights (once)
                      + b_pad * OUTPUT_DIM_PAD * 4)           # f32 output
    cost = pl.CostEstimate(flops=flops,
                           transcendentals=b_pad * OUTPUT_DIM_PAD,
                           bytes_accessed=bytes_accessed)

    out_padded = pl.pallas_call(
        _mlp_logsoftmax_kernel,
        out_shape=jax.ShapeDtypeStruct((b_pad, OUTPUT_DIM_PAD), jnp.float32),
        grid=grid,
        in_specs=[
            # x: one batch tile per grid step (pipelined DMA); K=784 is the full dim.
            pl.BlockSpec((tb, INPUT_DIM), lambda i: (i, 0)),
            # Weights: constant block index -> VMEM-resident, DMA'd once.
            pl.BlockSpec((INPUT_DIM, LATENT_DIM), lambda i: (0, 0)),
            pl.BlockSpec((LATENT_DIM, LATENT_DIM), lambda i: (0, 0)),
            pl.BlockSpec((LATENT_DIM, OUTPUT_DIM_PAD), lambda i: (0, 0)),
        ],
        out_specs=pl.BlockSpec((tb, OUTPUT_DIM_PAD), lambda i: (i, 0)),
        compiler_params=pltpu.CompilerParams(
            dimension_semantics=("parallel",),
            vmem_limit_bytes=32 * 1024 * 1024,
        ),
        cost_estimate=cost,
    )(x2d, w1p, w2p, w3p)

    # Slice stays inside the same jit, so it fuses with the consumer.
    return out_padded[:b, :OUTPUT_DIM]


def init_params(key):
    """Deterministic weight init.  Weights stored as (in_features, out_features), f32."""
    k1, k2, k3 = jax.random.split(key, 3)
    w1 = jax.random.uniform(k1, (INPUT_DIM, LATENT_DIM), jnp.float32,
                            minval=-1.0, maxval=1.0) / jnp.sqrt(INPUT_DIM)
    w2 = jax.random.uniform(k2, (LATENT_DIM, LATENT_DIM), jnp.float32,
                            minval=-1.0, maxval=1.0) / jnp.sqrt(LATENT_DIM)
    w3 = jax.random.uniform(k3, (LATENT_DIM, OUTPUT_DIM), jnp.float32,
                            minval=-1.0, maxval=1.0) / jnp.sqrt(LATENT_DIM)
    return w1, w2, w3


def _reference_f32(x, w1, w2, w3):
    x2d = x.reshape(-1, INPUT_DIM).astype(jnp.float32)
    h = jnp.maximum(x2d @ w1, 0.0)
    h = jnp.maximum(h @ w2, 0.0)
    logits = h @ w3
    return jax.nn.log_softmax(logits, axis=1)


def _reference_bf16(x, w1, w2, w3):
    # Mirrors the kernel's dtype sequence (bf16 matmul inputs, f32 accumulation).
    x2d = x.reshape(-1, INPUT_DIM).astype(jnp.bfloat16)
    w1b, w2b, w3b = (w.astype(jnp.bfloat16) for w in (w1, w2, w3))
    h = jnp.dot(x2d, w1b, preferred_element_type=jnp.float32)
    h = jnp.maximum(h, 0.0).astype(jnp.bfloat16)
    h = jnp.dot(h, w2b, preferred_element_type=jnp.float32)
    h = jnp.maximum(h, 0.0).astype(jnp.bfloat16)
    logits = jnp.dot(h, w3b, preferred_element_type=jnp.float32)
    return jax.nn.log_softmax(logits, axis=1)


if __name__ == "__main__":
    key = jax.random.PRNGKey(0)
    kx, kp = jax.random.split(key)

    batch = 10  # matches the module's batch_proc_size
    # Synthetic "MNIST-like" normalized input, NCHW.
    x = jax.random.normal(kx, (batch, 1, 28, 28), dtype=jnp.float32)
    w1, w2, w3 = init_params(kp)
    w1p, w2p, w3p = prepare_weights(w1, w2, w3)   # one-time weight prep

    out = simple_expanded_dnn_forward(x, w1p, w2p, w3p)
    out = jax.block_until_ready(out)
    assert out.shape == (batch, OUTPUT_DIM)

    # Tight check vs a reference that mirrors the kernel's bf16/f32 dtype path.
    ref_bf16 = _reference_bf16(x, w1, w2, w3)
    assert jnp.allclose(out, ref_bf16, atol=2e-3, rtol=2e-3), "mismatch vs bf16 reference"

    # Looser semantic check vs the full-f32 PyTorch-equivalent forward.
    ref_f32 = _reference_f32(x, w1, w2, w3)
    assert jnp.allclose(out, ref_f32, atol=5e-2, rtol=5e-2), "mismatch vs f32 reference"

    # Exercise a multi-tile / odd-size batch path (balanced tiles, >=2 grid steps).
    batch2 = 600
    x2 = jax.random.normal(jax.random.PRNGKey(1), (batch2, 1, 28, 28), dtype=jnp.float32)
    out2 = jax.block_until_ready(simple_expanded_dnn_forward(x2, w1p, w2p, w3p))
    assert out2.shape == (batch2, OUTPUT_DIM)
    ref2 = _reference_bf16(x2, w1, w2, w3)
    assert jnp.allclose(out2, ref2, atol=2e-3, rtol=2e-3), "mismatch vs bf16 reference (B=600)"

    print("KERNEL_OK")
</pallas_src>

<mosaic_0001>
module attributes {stable_mosaic.version = 11 : i64} {
  func.func @_mlp_logsoftmax_kernel(%arg0: i32, %arg1: memref<16x784xf32, #tpu.memory_space<vmem>>, %arg2: memref<784x512xbf16, #tpu.memory_space<vmem>>, %arg3: memref<512x512xbf16, #tpu.memory_space<vmem>>, %arg4: memref<512x128xbf16, #tpu.memory_space<vmem>>, %arg5: memref<16x128xf32, #tpu.memory_space<vmem>>) attributes {dimension_semantics = [#tpu.dimension_semantics<parallel>], iteration_bounds = array<i64: 1>, scalar_prefetch = 0 : i64, scratch_operands = 0 : i64, tpu.core_type = #tpu.core_type<tc>, window_params = [{transform_indices = @transform_0, window_bounds = array<i64: 16, 784>}, {pipeline_mode = #tpu.pipeline_mode<synchronous>, transform_indices = @transform_1, window_bounds = array<i64: 784, 512>}, {pipeline_mode = #tpu.pipeline_mode<synchronous>, transform_indices = @transform_2, window_bounds = array<i64: 512, 512>}, {pipeline_mode = #tpu.pipeline_mode<synchronous>, transform_indices = @transform_3, window_bounds = array<i64: 512, 128>}, {transform_indices = @transform_4, window_bounds = array<i64: 16, 128>}]} {
    %c0 = arith.constant 0 : index
    %c0_0 = arith.constant 0 : index
    %0 = vector.load %arg1[%c0, %c0_0] : memref<16x784xf32, #tpu.memory_space<vmem>>, vector<16x784xf32>
    %1 = arith.truncf %0 : vector<16x784xf32> to vector<16x784xbf16>
    %c0_1 = arith.constant 0 : index
    %c0_2 = arith.constant 0 : index
    %2 = vector.load %arg2[%c0_1, %c0_2] : memref<784x512xbf16, #tpu.memory_space<vmem>>, vector<784x512xbf16>
    %cst = arith.constant dense<0.000000e+00> : vector<16x512xf32>
    %3 = tpu.matmul %1, %2, %cst {dimension_numbers = #tpu.dot_dimension_numbers<[1], [0], [0], [1], [0, 0, 1, 1], [], []>} : vector<16x784xbf16>, vector<784x512xbf16>, vector<16x512xf32> -> vector<16x512xf32>
    %cst_3 = arith.constant 0.000000e+00 : f32
    %4 = vector.broadcast %cst_3 : f32 to vector<16x512xf32>
    %5 = arith.maximumf %3, %4 : vector<16x512xf32>
    %6 = arith.truncf %5 : vector<16x512xf32> to vector<16x512xbf16>
    %c0_4 = arith.constant 0 : index
    %c0_5 = arith.constant 0 : index
    %7 = vector.load %arg3[%c0_4, %c0_5] : memref<512x512xbf16, #tpu.memory_space<vmem>>, vector<512x512xbf16>
    %cst_6 = arith.constant dense<0.000000e+00> : vector<16x512xf32>
    %8 = tpu.matmul %6, %7, %cst_6 {dimension_numbers = #tpu.dot_dimension_numbers<[1], [0], [0], [1], [0, 0, 1, 1], [], []>} : vector<16x512xbf16>, vector<512x512xbf16>, vector<16x512xf32> -> vector<16x512xf32>
    %cst_7 = arith.constant 0.000000e+00 : f32
    %9 = vector.broadcast %cst_7 : f32 to vector<16x512xf32>
    %10 = arith.maximumf %8, %9 : vector<16x512xf32>
    %11 = arith.truncf %10 : vector<16x512xf32> to vector<16x512xbf16>
    %c0_8 = arith.constant 0 : index
    %c0_9 = arith.constant 0 : index
    %12 = vector.load %arg4[%c0_8, %c0_9] : memref<512x128xbf16, #tpu.memory_space<vmem>>, vector<512x128xbf16>
    %cst_10 = arith.constant dense<0.000000e+00> : vector<16x128xf32>
    %13 = tpu.matmul %11, %12, %cst_10 {dimension_numbers = #tpu.dot_dimension_numbers<[1], [0], [0], [1], [0, 0, 1, 1], [], []>} : vector<16x512xbf16>, vector<512x128xbf16>, vector<16x128xf32> -> vector<16x128xf32>
    %14 = tpu.iota {dimensions = array<i32: 1>} : vector<16x128xi32>
    %c10_i32 = arith.constant 10 : i32
    %15 = vector.broadcast %c10_i32 : i32 to vector<16x128xi32>
    %16 = arith.cmpi slt, %14, %15 : vector<16x128xi32>
    %cst_11 = arith.constant -1.000000e+30 : f32
    %17 = vector.broadcast %cst_11 : f32 to vector<16x128xf32>
    %18 = arith.select %16, %13, %17 : vector<16x128xi1>, vector<16x128xf32>
    %cst_12 = arith.constant dense<0xFF800000> : vector<16xf32>
    %19 = vector.multi_reduction <maximumf>, %18, %cst_12 [1] : vector<16x128xf32> to vector<16xf32>
    %20 = vector.shape_cast %19 : vector<16xf32> to vector<16x1xf32>
    %21 = vector.broadcast %20 : vector<16x1xf32> to vector<16x128xf32>
    %22 = arith.subf %18, %21 : vector<16x128xf32>
    %23 = math.exp %22 : vector<16x128xf32>
    %cst_13 = arith.constant dense<0.000000e+00> : vector<16xf32>
    %24 = vector.multi_reduction <add>, %23, %cst_13 [1] : vector<16x128xf32> to vector<16xf32>
    %25 = vector.shape_cast %24 : vector<16xf32> to vector<16x1xf32>
    %26 = math.log %25 : vector<16x1xf32>
    %27 = vector.broadcast %26 : vector<16x1xf32> to vector<16x128xf32>
    %28 = arith.subf %22, %27 : vector<16x128xf32>
    %c0_14 = arith.constant 0 : index
    %c0_15 = arith.constant 0 : index
    %29 = vector.load %arg5[%c0_14, %c0_15] : memref<16x128xf32, #tpu.memory_space<vmem>>, vector<16x128xf32>
    tpu.vector_store %arg5[%c0_14, %c0_15], %28 {strides = array<i32>} : memref<16x128xf32, #tpu.memory_space<vmem>>, vector<16x128xf32>,
    return
  }
  func.func @transform_0(%arg0: i32) -> (i32, i32) {
    %c0_i32 = arith.constant 0 : i32
    %c0_i32_0 = arith.constant 0 : i32
    return %arg0, %c0_i32 : i32, i32
  }
  func.func @transform_1(%arg0: i32) -> (i32, i32) {
    %c0_i32 = arith.constant 0 : i32
    %c0_i32_0 = arith.constant 0 : i32
    %c0_i32_1 = arith.constant 0 : i32
    return %c0_i32, %c0_i32_0 : i32, i32
  }
  func.func @transform_2(%arg0: i32) -> (i32, i32) {
    %c0_i32 = arith.constant 0 : i32
    %c0_i32_0 = arith.constant 0 : i32
    %c0_i32_1 = arith.constant 0 : i32
    return %c0_i32, %c0_i32_0 : i32, i32
  }
  func.func @transform_3(%arg0: i32) -> (i32, i32) {
    %c0_i32 = arith.constant 0 : i32
    %c0_i32_0 = arith.constant 0 : i32
    %c0_i32_1 = arith.constant 0 : i32
    return %c0_i32, %c0_i32_0 : i32, i32
  }
  func.func @transform_4(%arg0: i32) -> (i32, i32) {
    %c0_i32 = arith.constant 0 : i32
    %c0_i32_0 = arith.constant 0 : i32
    return %arg0, %c0_i32 : i32, i32
  }
}

</mosaic_0001>

<bundles_post_ra>
// kernel: simple_expanded_dnn_forward.1
= control target key start
LH: loop header
LB: loop body
LE: loop exit
PB: predicated region body
PF: predicated region fallthrough
CT: control target
= control target key end

     0   :  { %9 = vsyncpa [#allocation3], 0  ;;  %s4453_s0 = inlined_call_operand.vmem [shape: f32[16,784], index: 0, kind: input, shape index: {}]   ;;  %s4454_s1 = inlined_call_operand.hbm [shape: bf16[784,512], index: 1, kind: input, shape index: {}]   ;;  %s4455_s2 = inlined_call_operand.vmem [shape: bf16[512,512], index: 2, kind: input, shape index: {}]   ;;  %s4456_s3 = inlined_call_operand.hbm [shape: bf16[512,128], index: 3, kind: input, shape index: {}]   ;;  %s4457_s4 = inlined_call_operand.hbm [shape: f32[16,128], index: 4, kind: output, shape index: {}]  }
   0x1   :  { %10 = vsyncpa [#allocation6], 0 }
   0x2   :  { %11 = vsyncpa [#allocation4], 0  ;;  %s3943_s15 = smov [#allocation2]  }
   0x3   :  { %s19_s16 = sshll.u32 %s3943_s15, 4  ;;  %s20_s16 = int_to_ptr.vmem [resolvable:$true] %s19_s16 }
   0x4   :  { %s3885_s17 = scalar_lea.vmem %s20_s16, 25088  ;;  %p3890_p1 = scmp.lt.s32.totalorder %s20_s16, %s20_s16 }
   0x5   :  { %p3886_p0 = scmp.ne.s32.totalorder %s20_s16, %s3885_s17  ;;  %p3891_p2 = scmp.lt.s32.totalorder %s3885_s17, %s3885_s17 }
   0x7   :  { %p3892_p3 = por %p3891_p2, %p3890_p1 }
   0x9   :  { %p3893_p4 = pnand %p3892_p3, %p3886_p0 }
   0xb   :  { %3896 = shalt.err (!%p3893_p4)
}
   0xc   :  { %s3944_s18 = smov 256   ;;  %s3945_s19 = smov 16  }
   0xd   :  { %25 = dma.hbm_to_vmem [thread:$0]  %s4454_s1, 25088, %s20_s16, [#allocation3], %s3944_s18, %s3944_s18, %s3945_s19  }
   0xe   :  { %s3946_s22 = smov [#allocation5]  }
   0xf   :  { %s33_s23 = sshll.u32 %s3946_s22, 4  ;;  %s34_s23 = int_to_ptr.vmem [resolvable:$true] %s33_s23 }
  0x10   :  { %s3905_s24 = scalar_lea.vmem %s34_s23, 4096  ;;  %p3910_p6 = scmp.lt.s32.totalorder %s34_s23, %s34_s23 }
  0x11   :  { %p3906_p5 = scmp.ne.s32.totalorder %s34_s23, %s3905_s24  ;;  %p3911_p7 = scmp.lt.s32.totalorder %s3905_s24, %s3905_s24 }
  0x13   :  { %p3912_p8 = por %p3911_p7, %p3910_p6 }
  0x15   :  { %p3913_p9 = pnand %p3912_p8, %p3906_p5 }
  0x17   :  { %3916 = shalt.err (!%p3913_p9)
}
  0x18   :  { %s3947_s25 = smov 64   ;;  %s3948_s26 = smov 4  }
  0x19   :  { %39 = dma.hbm_to_vmem [thread:$0]  %s4456_s3, 4096, %s34_s23, [#allocation6], %s3947_s25, %s3947_s25, %s3948_s26  }
  0x1a   :  { %3937 = dma.done.wait [#allocation3], 25088  }
  0x1b   :  { %3938 = vsyncadd [#allocation3], 4294942208 }
  0x1c   :  { %3939 = dma.done.wait [#allocation6], 4096  }
  0x1d   :  { %3940 = vsyncadd [#allocation6], 4294963200  ;;  %v3351_v0 = vld [vmem:[#allocation2 + $0xe4] ss:$16 sps:$4 sm:$0xff]   ;;  %v3355_v2 = vld [vmem:[#allocation2 + $0xe0] ss:$16 sps:$4 sm:$0xff]  }
  0x1e   :  { %v3353_v1 = vld [vmem:[#allocation2 + $0x2e4] ss:$16 sps:$4 sm:$0xff]   ;;  %1248 = vmatprep.subr.bf16.mxu0 %v3351_v0  ;;  %v3356_v3 = vld [vmem:[#allocation2 + $0x2e0] ss:$16 sps:$4 sm:$0xff]   ;;  %v48_v46 = vld [vmem:[%s4453_s0 + $0x8] sm:$0xff]  ;;  %vm1244_vm0 = vcmask 130048  }
  0x1f   :  { %1291 = vmatprep.subr.bf16.mxu1 %v3353_v1  ;;  %v3357_v4 = vld [vmem:[#allocation2 + $0xc4] ss:$16 sps:$4 sm:$0xff]   ;;  %1249 = vmatpush1.bf16.msra.mxu0 %v3355_v2  ;;  %v3361_v6 = vld [vmem:[#allocation2 + $0xc0] ss:$16 sps:$4 sm:$0xff]   ;;  %v50_v48 = vld [vmem:[%s4453_s0 + $0x18] sm:$0xff] }
  0x20   :  { %1292 = vmatpush1.bf16.msra.mxu1 %v3356_v3  ;;  %v3359_v5 = vld [vmem:[#allocation2 + $0x2c4] ss:$16 sps:$4 sm:$0xff]   ;;  %1250 = vmatprep.subr.bf16.mxu0 %v3357_v4  ;;  %v3362_v7 = vld [vmem:[#allocation2 + $0x2c0] ss:$16 sps:$4 sm:$0xff]  }
  0x21   :  { %1293 = vmatprep.subr.bf16.mxu1 %v3359_v5  ;;  %v3363_v8 = vld [vmem:[#allocation2 + $0xa4] ss:$16 sps:$4 sm:$0xff]   ;;  %v3367_v10 = vld [vmem:[#allocation2 + $0xa0] ss:$16 sps:$4 sm:$0xff]  }
  0x22   :  { %v3365_v9 = vld [vmem:[#allocation2 + $0x2a4] ss:$16 sps:$4 sm:$0xff]   ;;  %v3368_v11 = vld [vmem:[#allocation2 + $0x2a0] ss:$16 sps:$4 sm:$0xff]  }
  0x23   :  { %1251 = vmatpush1.bf16.msra.mxu0 %v3361_v6  ;;  %v3369_v12 = vld [vmem:[#allocation2 + $0x84] ss:$16 sps:$4 sm:$0xff]   ;;  %v3373_v14 = vld [vmem:[#allocation2 + $0x80] ss:$16 sps:$4 sm:$0xff]  }
  0x24   :  { %1294 = vmatpush1.bf16.msra.mxu1 %v3362_v7  ;;  %1252 = vmatprep.subr.bf16.mxu0 %v3363_v8  ;;  %v3371_v13 = vld [vmem:[#allocation2 + $0x284] ss:$16 sps:$4 sm:$0xff]   ;;  %v3374_v15 = vld [vmem:[#allocation2 + $0x280] ss:$16 sps:$4 sm:$0xff]   ;;  %v54_v7 = vld [vmem:[%s4453_s0 + $0x38] sm:$0xff] }
  0x25   :  { %1295 = vmatprep.subr.bf16.mxu1 %v3365_v9  ;;  %v3375_v16 = vld [vmem:[#allocation2 + $0x64] ss:$16 sps:$4 sm:$0xff]   ;;  %v3379_v18 = vld [vmem:[#allocation2 + $0x60] ss:$16 sps:$4 sm:$0xff]   ;;  %v56_v9 = vld [vmem:[%s4453_s0 + $0x48] sm:$0xff] }
  0x26   :  { %v3377_v17 = vld [vmem:[#allocation2 + $0x264] ss:$16 sps:$4 sm:$0xff]   ;;  %v3380_v19 = vld [vmem:[#allocation2 + $0x260] ss:$16 sps:$4 sm:$0xff]  }
  0x27   :  { %1253 = vmatpush1.bf16.msra.mxu0 %v3367_v10  ;;  %v3381_v20 = vld [vmem:[#allocation2 + $0x44] ss:$16 sps:$4 sm:$0xff]   ;;  %v3385_v22 = vld [vmem:[#allocation2 + $0x40] ss:$16 sps:$4 sm:$0xff]  }
  0x28   :  { %1296 = vmatpush1.bf16.msra.mxu1 %v3368_v11  ;;  %1254 = vmatprep.subr.bf16.mxu0 %v3369_v12  ;;  %v3383_v21 = vld [vmem:[#allocation2 + $0x244] ss:$16 sps:$4 sm:$0xff]   ;;  %v3386_v23 = vld [vmem:[#allocation2 + $0x240] ss:$16 sps:$4 sm:$0xff]  }
  0x29   :  { %1297 = vmatprep.subr.bf16.mxu1 %v3371_v13  ;;  %v3387_v24 = vld [vmem:[#allocation2 + $0x24] ss:$16 sps:$4 sm:$0xff]   ;;  %v3391_v26 = vld [vmem:[#allocation2 + $0x20] ss:$16 sps:$4 sm:$0xff]  }
  0x2a   :  { %v3389_v25 = vld [vmem:[#allocation2 + $0x224] ss:$16 sps:$4 sm:$0xff]   ;;  %v3392_v27 = vld [vmem:[#allocation2 + $0x220] ss:$16 sps:$4 sm:$0xff]  }
  0x2b   :  { %1255 = vmatpush1.bf16.msra.mxu0 %v3373_v14  ;;  %v3393_v28 = vld [vmem:[#allocation2 + $0x4] ss:$16 sps:$4 sm:$0xff]   ;;  %v3397_v30 = vld [vmem:[#allocation2] ss:$16 sps:$4 sm:$0xff]  }
  0x2c   :  { %1298 = vmatpush1.bf16.msra.mxu1 %v3374_v15  ;;  %1256 = vmatprep.subr.bf16.mxu0 %v3375_v16  ;;  %v3395_v29 = vld [vmem:[#allocation2 + $0x204] ss:$16 sps:$4 sm:$0xff]   ;;  %v3398_v31 = vld [vmem:[#allocation2 + $0x200] ss:$16 sps:$4 sm:$0xff]  }
  0x2d   :  { %1299 = vmatprep.subr.bf16.mxu1 %v3377_v17  ;;  %v3399_v32 = vld [vmem:[#allocation2 + $0x1e4] ss:$16 sps:$4 sm:$0xff]   ;;  %v3403_v34 = vld [vmem:[#allocation2 + $0x1e0] ss:$16 sps:$4 sm:$0xff]   ;;  %v3458_v17 = vld [vmem:[#allocation2 + $0xec] ss:$16 sps:$4 sm:$0xff]  }
  0x2e   :  { %v3401_v33 = vld [vmem:[#allocation2 + $0x3e4] ss:$16 sps:$4 sm:$0xff]   ;;  %v3404_v35 = vld [vmem:[#allocation2 + $0x3e0] ss:$16 sps:$4 sm:$0xff]  }
  0x2f   :  { %1257 = vmatpush1.bf16.msra.mxu0 %v3379_v18  ;;  %v3405_v36 = vld [vmem:[#allocation2 + $0x1c4] ss:$16 sps:$4 sm:$0xff]   ;;  %v3409_v38 = vld [vmem:[#allocation2 + $0x1c0] ss:$16 sps:$4 sm:$0xff]  }
  0x30   :  { %1300 = vmatpush1.bf16.msra.mxu1 %v3380_v19  ;;  %1258 = vmatprep.subr.bf16.mxu0 %v3381_v20  ;;  %v3407_v37 = vld [vmem:[#allocation2 + $0x3c4] ss:$16 sps:$4 sm:$0xff]   ;;  %v3410_v39 = vld [vmem:[#allocation2 + $0x3c0] ss:$16 sps:$4 sm:$0xff]   ;;  %v60_v20 = vld [vmem:[%s4453_s0 + $0x68] sm:$0xff] }
  0x31   :  { %1301 = vmatprep.subr.bf16.mxu1 %v3383_v21  ;;  %v3411_v40 = vld [vmem:[#allocation2 + $0x1a4] ss:$16 sps:$4 sm:$0xff]   ;;  %v3415_v42 = vld [vmem:[#allocation2 + $0x1a0] ss:$16 sps:$4 sm:$0xff]   ;;  %v3949_v21 = vmov 0  }
  0x32   :  { %v3413_v41 = vld [vmem:[#allocation2 + $0x3a4] ss:$16 sps:$4 sm:$0xff]   ;;  %v3416_v43 = vld [vmem:[#allocation2 + $0x3a0] ss:$16 sps:$4 sm:$0xff]  }
  0x33   :  { %1259 = vmatpush1.bf16.msra.mxu0 %v3385_v22  ;;  %v3417_v44 = vld [vmem:[#allocation2 + $0x184] ss:$16 sps:$4 sm:$0xff]   ;;  %v3421_v50 = vld [vmem:[#allocation2 + $0x180] ss:$16 sps:$4 sm:$0xff]  }
  0x34   :  { %1302 = vmatpush1.bf16.msra.mxu1 %v3386_v23  ;;  %1260 = vmatprep.subr.bf16.mxu0 %v3387_v24  ;;  %v3419_v45 = vld [vmem:[#allocation2 + $0x384] ss:$16 sps:$4 sm:$0xff]   ;;  %v3422_v51 = vld [vmem:[#allocation2 + $0x380] ss:$16 sps:$4 sm:$0xff]   ;;  %v3456_v24 = vld [vmem:[#allocation2 + $0xe8] ss:$16 sps:$4 sm:$0xff]  }
  0x35   :  { %1303 = vmatprep.subr.bf16.mxu1 %v3389_v25  ;;  %v55_v47 = vld [vmem:[%s4453_s0 + $0x40] sm:$0xff]  ;;  %v57_v49 = vld [vmem:[%s4453_s0 + $0x50] sm:$0xff] }
  0x36   :  { %v3423_v52 = vld [vmem:[#allocation2 + $0x164] ss:$16 sps:$4 sm:$0xff]   ;;  %v3996_v53 = vpack.c.bf16 %v55_v47, %v48_v46  ;;  %v3998_v54 = vpack.c.bf16 %v57_v49, %v50_v48  ;;  %v3427_v56 = vld [vmem:[#allocation2 + $0x160] ss:$16 sps:$4 sm:$0xff]   ;;  %v3486_v47 = vld [vmem:[#allocation2 + $0x48] ss:$16 sps:$4 sm:$0xff]  }
  0x37   :  { %1261 = vmatpush1.bf16.msra.mxu0 %v3391_v26  ;;  %v3425_v55 = vld [vmem:[#allocation2 + $0x364] ss:$16 sps:$4 sm:$0xff]   ;;  %v3428_v57 = vld [vmem:[#allocation2 + $0x360] ss:$16 sps:$4 sm:$0xff]   ;;  %v3464_v26 = vld [vmem:[#allocation2 + $0xcc] ss:$16 sps:$4 sm:$0xff]  }
  0x38   :  { %1304 = vmatpush1.bf16.msra.mxu1 %v3392_v27  ;;  %1262 = vmatprep.subr.bf16.mxu0 %v3393_v28  ;;  %v3429_v58 = vld [vmem:[#allocation2 + $0x144] ss:$16 sps:$4 sm:$0xff]   ;;  %v3433_v60 = vld [vmem:[#allocation2 + $0x140] ss:$16 sps:$4 sm:$0xff]   ;;  %v3462_v28 = vld [vmem:[#allocation2 + $0xc8] ss:$16 sps:$4 sm:$0xff]  }
  0x39   :  { %1305 = vmatprep.subr.bf16.mxu1 %v3395_v29  ;;  %1280 = vmatprep.mubr.bf16.mxu0 %v3996_v53  ;;  %v3431_v59 = vld [vmem:[#allocation2 + $0x344] ss:$16 sps:$4 sm:$0xff]   ;;  %v3434_v61 = vld [vmem:[#allocation2 + $0x340] ss:$16 sps:$4 sm:$0xff]   ;;  %v3494_v49 = vld [vmem:[#allocation2 + $0x2c] ss:$16 sps:$4 sm:$0xff]  }
  0x3a   :  { %1323 = vmatprep.mubr.bf16.mxu1 %v3998_v54  ;;  %v3435_v62 = vld [vmem:[#allocation2 + $0x124] ss:$16 sps:$4 sm:$0xff]   ;;  %v3439_v0 = vld [vmem:[#allocation2 + $0x120] ss:$16 sps:$4 sm:$0xff]  }
  0x3b   :  { %1263 = vmatpush1.bf16.msra.mxu0 %v3397_v30  ;;  %v3437_v63 = vld [vmem:[#allocation2 + $0x324] ss:$16 sps:$4 sm:$0xff]   ;;  %v3440_v1 = vld [vmem:[#allocation2 + $0x320] ss:$16 sps:$4 sm:$0xff]   ;;  %v3470_v30 = vld [vmem:[#allocation2 + $0xac] ss:$16 sps:$4 sm:$0xff]  }
  0x3c   :  { %1306 = vmatpush1.bf16.msra.mxu1 %v3398_v31  ;;  %1264 = vmatprep.subr.bf16.mxu0 %v3399_v32  ;;  %v3441_v2 = vld [vmem:[#allocation2 + $0x104] ss:$16 sps:$4 sm:$0xff]   ;;  %v3445_v4 = vld [vmem:[#allocation2 + $0x100] ss:$16 sps:$4 sm:$0xff]   ;;  %v3468_v32 = vld [vmem:[#allocation2 + $0xa8] ss:$16 sps:$4 sm:$0xff]  }
  0x3d   :  { %1307 = vmatprep.subr.bf16.mxu1 %v3401_v33  ;;  %v3443_v3 = vld [vmem:[#allocation2 + $0x304] ss:$16 sps:$4 sm:$0xff]   ;;  %v3446_v5 = vld [vmem:[#allocation2 + $0x300] ss:$16 sps:$4 sm:$0xff]  }
  0x3e   :  { %v47_v6 = vld [vmem:[%s4453_s0] sm:$0xff]  ;;  %v49_v8 = vld [vmem:[%s4453_s0 + $0x10] sm:$0xff] }
  0x3f   :  { %1265 = vmatpush2.bf16.msra.mxu0 %v3403_v34  ;;  %v3449_v10 = vld [vmem:[#allocation2 + $0x4e4] ss:$16 sps:$4 sm:$0xff]   ;;  %v4014_v12 = vpack.c.bf16 %v54_v7, %v47_v6  ;;  %v4016_v13 = vpack.c.bf16 %v56_v9, %v49_v8  ;;  %v3447_v14 = vld [vmem:[#allocation2 + $0x4e0] ss:$16 sps:$4 sm:$0xff]   ;;  %v3476_v34 = vld [vmem:[#allocation2 + $0x8c] ss:$16 sps:$4 sm:$0xff]  }
  0x40   :  { %1308 = vmatpush2.bf16.msra.mxu1 %v3404_v35  ;;  %1266 = vmatprep.subr.bf16.mxu0 %v3405_v36  ;;  %v3452_v11 = vld [vmem:[#allocation2 + $0x604] ss:$16 sps:$4 sm:$0xff]   ;;  %v3450_v15 = vld [vmem:[#allocation2 + $0x600] ss:$16 sps:$4 sm:$0xff]   ;;  %v3474_v36 = vld [vmem:[#allocation2 + $0x88] ss:$16 sps:$4 sm:$0xff]  }
  0x41   :  { %1309 = vmatprep.subr.bf16.mxu1 %v3407_v37  ;;  %v3455_v16 = vld [vmem:[#allocation2 + $0x4c4] ss:$16 sps:$4 sm:$0xff]   ;;  %v3453_v18 = vld [vmem:[#allocation2 + $0x4c0] ss:$16 sps:$4 sm:$0xff]   ;;  %v3524_v6 = vld [vmem:[#allocation2 + $0x18c] ss:$16 sps:$4 sm:$0xff]  }
  0x42   :  { %v53_v19 = vld [vmem:[%s4453_s0 + $0x30] sm:$0xff]  ;;  %v3522_v8 = vld [vmem:[#allocation2 + $0x188] ss:$16 sps:$4 sm:$0xff]  }
  0x43   :  { %1267 = vmatpush2.bf16.msra.mxu0 %v3409_v38  ;;  %v3461_v22 = vld [vmem:[#allocation2 + $0x4a4] ss:$16 sps:$4 sm:$0xff]   ;;  %v4027_v23 = vpack.c.bf16 %v60_v20, %v53_v19  ;;  %v3459_v25 = vld [vmem:[#allocation2 + $0x4a0] ss:$16 sps:$4 sm:$0xff]   ;;  %v3482_v38 = vld [vmem:[#allocation2 + $0x6c] ss:$16 sps:$4 sm:$0xff]  }
  0x44   :  { %1310 = vmatpush2.bf16.msra.mxu1 %v3410_v39  ;;  %1268 = vmatprep.subr.bf16.mxu0 %v3411_v40  ;;  %v3467_v27 = vld [vmem:[#allocation2 + $0x484] ss:$16 sps:$4 sm:$0xff]   ;;  %v3465_v29 = vld [vmem:[#allocation2 + $0x480] ss:$16 sps:$4 sm:$0xff]   ;;  %v3480_v40 = vld [vmem:[#allocation2 + $0x68] ss:$16 sps:$4 sm:$0xff]  }
  0x45   :  { %1311 = vmatprep.subr.bf16.mxu1 %v3413_v41  ;;  %v3473_v31 = vld [vmem:[#allocation2 + $0x464] ss:$16 sps:$4 sm:$0xff]   ;;  %v3471_v33 = vld [vmem:[#allocation2 + $0x460] ss:$16 sps:$4 sm:$0xff]   ;;  %v52_v41 = vld [vmem:[%s4453_s0 + $0x28] sm:$0xff] }
  0x46   :  { %v3479_v35 = vld [vmem:[#allocation2 + $0x444] ss:$16 sps:$4 sm:$0xff]   ;;  %v3477_v37 = vld [vmem:[#allocation2 + $0x440] ss:$16 sps:$4 sm:$0xff]  }
  0x47   :  { %1269 = vmatpush2.bf16.msra.mxu0 %v3415_v42  ;;  %v3485_v39 = vld [vmem:[#allocation2 + $0x424] ss:$16 sps:$4 sm:$0xff]   ;;  %v3489_v48 = vld [vmem:[#allocation2 + $0x400] ss:$16 sps:$4 sm:$0xff]  }
  0x48   :  { %1312 = vmatpush2.bf16.msra.mxu1 %v3416_v43  ;;  %1270 = vmatprep.subr.bf16.mxu0 %v3417_v44  ;;  %v59_v42 = vld [vmem:[%s4453_s0 + $0x60] sm:$0xff] }
  0x49   :  { %1313 = vmatprep.subr.bf16.mxu1 %v3419_v45  ;;  %v3483_v43 = vld [vmem:[#allocation2 + $0x420] ss:$16 sps:$4 sm:$0xff]   ;;  %v4038_v44 = vpack.c.bf16 %v59_v42, %v52_v41  ;;  %v3488_v45 = vld [vmem:[#allocation2 + $0x4c] ss:$16 sps:$4 sm:$0xff]   ;;  %v3491_v46 = vld [vmem:[#allocation2 + $0x404] ss:$16 sps:$4 sm:$0xff]  }
  0x4a   :  { %v3527_v7 = vld [vmem:[#allocation2 + $0x544] ss:$16 sps:$4 sm:$0xff]   ;;  %v3525_v9 = vld [vmem:[#allocation2 + $0x540] ss:$16 sps:$4 sm:$0xff]   ;;  %v3566_v41 = vld [vmem:[#allocation2 + $0x4ac] ss:$16 sps:$4 sm:$0xff]  }
  0x4b   :  { %1271 = vmatpush2.bf16.msra.mxu0 %v3421_v50  ;;  %v3497_v50 = vld [vmem:[#allocation2 + $0x5e4] ss:$16 sps:$4 sm:$0xff]   ;;  %v3537_v19 = vld [vmem:[#allocation2 + $0x500] ss:$16 sps:$4 sm:$0xff]   ;;  %v3569_v42 = vld [vmem:[#allocation2 + $0x26c] ss:$16 sps:$4 sm:$0xff]  }
  0x4c   :  { %1314 = vmatpush2.bf16.msra.mxu1 %v3422_v51  ;;  %1272 = vmatprep.subr.bf16.mxu0 %v3423_v52  ;;  %v3492_v51 = vld [vmem:[#allocation2 + $0x28] ss:$16 sps:$4 sm:$0xff]   ;;  %v3495_v52 = vld [vmem:[#allocation2 + $0x5e0] ss:$16 sps:$4 sm:$0xff]  }
  0x4d   :  { %1315 = vmatprep.subr.bf16.mxu1 %v3425_v55  ;;  %v3503_v55 = vld [vmem:[#allocation2 + $0x5c4] ss:$16 sps:$4 sm:$0xff]  }
  0x4e   :  { %v51_v20 = vld [vmem:[%s4453_s0 + $0x20] sm:$0xff] }
  0x4f   :  { %1273 = vmatpush2.bf16.msra.mxu0 %v3427_v56  ;;  %v3498_v56 = vld [vmem:[#allocation2 + $0x8] ss:$16 sps:$4 sm:$0xff]  }
  0x50   :  { %1316 = vmatpush2.bf16.msra.mxu1 %v3428_v57  ;;  %1274 = vmatprep.subr.bf16.mxu0 %v3429_v58  ;;  %v3501_v57 = vld [vmem:[#allocation2 + $0x5c0] ss:$16 sps:$4 sm:$0xff]   ;;  %v3506_v58 = vld [vmem:[#allocation2 + $0x1ec] ss:$16 sps:$4 sm:$0xff]  }
  0x51   :  { %1317 = vmatprep.subr.bf16.mxu1 %v3431_v59  ;;  %v3509_v59 = vld [vmem:[#allocation2 + $0x5a4] ss:$16 sps:$4 sm:$0xff]  }
  0x53   :  { %1275 = vmatpush2.bf16.msra.mxu0 %v3433_v60  ;;  %v3504_v60 = vld [vmem:[#allocation2 + $0x1e8] ss:$16 sps:$4 sm:$0xff]  }
  0x54   :  { %1318 = vmatpush2.bf16.msra.mxu1 %v3434_v61  ;;  %1276 = vmatprep.subr.bf16.mxu0 %v3435_v62  ;;  %v3507_v61 = vld [vmem:[#allocation2 + $0x5a0] ss:$16 sps:$4 sm:$0xff]   ;;  %v3512_v62 = vld [vmem:[#allocation2 + $0x1cc] ss:$16 sps:$4 sm:$0xff]  }
  0x55   :  { %1319 = vmatprep.subr.bf16.mxu1 %v3437_v63  ;;  %v3515_v63 = vld [vmem:[#allocation2 + $0x584] ss:$16 sps:$4 sm:$0xff]  }
  0x57   :  { %1277 = vmatpush2.bf16.msra.mxu0 %v3439_v0  ;;  %v3510_v0 = vld [vmem:[#allocation2 + $0x1c8] ss:$16 sps:$4 sm:$0xff]  }
  0x58   :  { %1320 = vmatpush2.bf16.msra.mxu1 %v3440_v1  ;;  %1278 = vmatprep.subr.bf16.mxu0 %v3441_v2  ;;  %v3513_v1 = vld [vmem:[#allocation2 + $0x580] ss:$16 sps:$4 sm:$0xff]   ;;  %v3518_v2 = vld [vmem:[#allocation2 + $0x1ac] ss:$16 sps:$4 sm:$0xff]  }
  0x59   :  { %1321 = vmatprep.subr.bf16.mxu1 %v3443_v3  ;;  %v3521_v3 = vld [vmem:[#allocation2 + $0x564] ss:$16 sps:$4 sm:$0xff]  }
  0x5b   :  { %1279 = vmatpush2.bf16.msra.mxu0 %v3445_v4  ;;  %v3516_v4 = vld [vmem:[#allocation2 + $0x1a8] ss:$16 sps:$4 sm:$0xff]  }
  0x5c   :  { %1322 = vmatpush2.bf16.msra.mxu1 %v3446_v5  ;;  %1334 = vmatprep.subr.bf16.mxu0 %v3449_v10  ;;  %v3519_v5 = vld [vmem:[#allocation2 + $0x560] ss:$16 sps:$4 sm:$0xff]   ;;  %v3530_v10 = vld [vmem:[#allocation2 + $0x16c] ss:$16 sps:$4 sm:$0xff]  }
  0x5d   :  { %1391 = vmatprep.subr.bf16.mxu1 %v3452_v11  ;;  %v3533_v11 = vld [vmem:[#allocation2 + $0x524] ss:$16 sps:$4 sm:$0xff]  }
  0x5e   :  { %1281 = vmatmul.mubr.bf16.vlgmr.msra.gmra.mxu0 %v4014_v12 }
  0x5f   :  { %1324 = vmatmul.mubr.bf16.vlgmr.msra.gmra.mxu1 %v4016_v13  ;;  %1335 = vmatpush1.bf16.msra.mxu0 %v3447_v14  ;;  %v3528_v14 = vld [vmem:[#allocation2 + $0x168] ss:$16 sps:$4 sm:$0xff]  }
  0x60   :  { %1392 = vmatpush1.bf16.msra.mxu1 %v3450_v15  ;;  %1336 = vmatprep.subr.bf16.mxu0 %v3455_v16  ;;  %v3531_v15 = vld [vmem:[#allocation2 + $0x520] ss:$16 sps:$4 sm:$0xff]   ;;  %v3536_v16 = vld [vmem:[#allocation2 + $0x14c] ss:$16 sps:$4 sm:$0xff]  }
  0x61   :  { %1409 = vmatprep.mubr.bf16.mxu1 %v3949_v21  ;;  %1420 = vmatprep.subr.bf16.mxu1 %v3458_v17  ;;  %v3539_v17 = vld [vmem:[#allocation2 + $0x504] ss:$16 sps:$4 sm:$0xff]  }
  0x62   :  { %1366 = vmatprep.mubr.bf16.mxu0 %v4038_v44 }
  0x63   :  { %1337 = vmatpush1.bf16.msra.mxu0 %v3453_v18  ;;  %v3534_v18 = vld [vmem:[#allocation2 + $0x148] ss:$16 sps:$4 sm:$0xff]  }
  0x64   :  { %1338 = vmatprep.subr.bf16.mxu0 %v3461_v22  ;;  %v58_v22 = vld [vmem:[%s4453_s0 + $0x58] sm:$0xff] }
  0x67   :  { %3135 = vmatmul.mubr.msk.bf16.vlgmr.msra.gmra.mxu1 %vm1244_vm0, %v4027_v23  ;;  %1339 = vmatpush1.bf16.msra.mxu0 %v3459_v25  ;;  %v3545_v25 = vld [vmem:[#allocation2 + $0x2ec] ss:$16 sps:$4 sm:$0xff]  }
  0x68   :  { %1421 = vmatpush1.bf16.msra.mxu1 %v3456_v24  ;;  %1340 = vmatprep.subr.bf16.mxu0 %v3467_v27  ;;  %v3542_v24 = vld [vmem:[#allocation2 + $0x12c] ss:$16 sps:$4 sm:$0xff]   ;;  %v3540_v27 = vld [vmem:[#allocation2 + $0x128] ss:$16 sps:$4 sm:$0xff]  }
  0x69   :  { %1422 = vmatprep.subr.bf16.mxu1 %v3464_v26  ;;  %1452 = vmatprep.mubr.bf16.mxu1 %v3996_v53  ;;  %v3500_v53 = vld [vmem:[#allocation2 + $0xc] ss:$16 sps:$4 sm:$0xff]   ;;  %v4047_v26 = vpack.c.bf16 %v58_v22, %v51_v20  ;;  %v3624_v20 = vld [vmem:[#allocation2 + $0x568] ss:$16 sps:$4 sm:$0xff]  }
  0x6a   :  { %v3627_v22 = vld [vmem:[#allocation2 + $0x328] ss:$16 sps:$4 sm:$0xff]  }
  0x6b   :  { %1341 = vmatpush1.bf16.msra.mxu0 %v3465_v29  ;;  %v3548_v29 = vld [vmem:[#allocation2 + $0x10c] ss:$16 sps:$4 sm:$0xff]  }
  0x6c   :  { %1423 = vmatpush1.bf16.msra.mxu1 %v3462_v28  ;;  %1342 = vmatprep.subr.bf16.mxu0 %v3473_v31  ;;  %v3543_v28 = vld [vmem:[#allocation2 + $0x2e8] ss:$16 sps:$4 sm:$0xff]  }
  0x6d   :  { %1424 = vmatprep.subr.bf16.mxu1 %v3470_v30  ;;  %v3551_v30 = vld [vmem:[#allocation2 + $0x2cc] ss:$16 sps:$4 sm:$0xff]   ;;  %v3546_v31 = vld [vmem:[#allocation2 + $0x108] ss:$16 sps:$4 sm:$0xff]  }
  0x6f   :  { %1343 = vmatpush1.bf16.msra.mxu0 %v3471_v33  ;;  %v3554_v33 = vld [vmem:[#allocation2 + $0x4ec] ss:$16 sps:$4 sm:$0xff]  }
  0x70   :  { %1425 = vmatpush1.bf16.msra.mxu1 %v3468_v32  ;;  %1344 = vmatprep.subr.bf16.mxu0 %v3479_v35  ;;  %v3549_v32 = vld [vmem:[#allocation2 + $0x2c8] ss:$16 sps:$4 sm:$0xff]  }
  0x71   :  { %1426 = vmatprep.subr.bf16.mxu1 %v3476_v34  ;;  %v3557_v34 = vld [vmem:[#allocation2 + $0x2ac] ss:$16 sps:$4 sm:$0xff]   ;;  %v3552_v35 = vld [vmem:[#allocation2 + $0x4e8] ss:$16 sps:$4 sm:$0xff]  }
  0x73   :  { %1345 = vmatpush1.bf16.msra.mxu0 %v3477_v37  ;;  %v3560_v37 = vld [vmem:[#allocation2 + $0x4cc] ss:$16 sps:$4 sm:$0xff]  }
  0x74   :  { %1427 = vmatpush1.bf16.msra.mxu1 %v3474_v36  ;;  %1346 = vmatprep.subr.bf16.mxu0 %v3485_v39  ;;  %v3555_v36 = vld [vmem:[#allocation2 + $0x2a8] ss:$16 sps:$4 sm:$0xff]  }
  0x75   :  { %1428 = vmatprep.subr.bf16.mxu1 %v3482_v38  ;;  %v3563_v38 = vld [vmem:[#allocation2 + $0x28c] ss:$16 sps:$4 sm:$0xff]   ;;  %v3558_v39 = vld [vmem:[#allocation2 + $0x4c8] ss:$16 sps:$4 sm:$0xff]  }
  0x77   :  { %1347 = vmatpush1.bf16.msra.mxu0 %v3483_v43  ;;  %v3564_v43 = vld [vmem:[#allocation2 + $0x4a8] ss:$16 sps:$4 sm:$0xff]  }
  0x78   :  { %1429 = vmatpush1.bf16.msra.mxu1 %v3480_v40  ;;  %1348 = vmatprep.subr.bf16.mxu0 %v3491_v46  ;;  %v3561_v40 = vld [vmem:[#allocation2 + $0x288] ss:$16 sps:$4 sm:$0xff]   ;;  %v3575_v46 = vld [vmem:[#allocation2 + $0x24c] ss:$16 sps:$4 sm:$0xff]  }
  0x79   :  { %1430 = vmatprep.subr.bf16.mxu1 %v3488_v45  ;;  %v3567_v45 = vld [vmem:[#allocation2 + $0x268] ss:$16 sps:$4 sm:$0xff]  }
  0x7b   :  { %1349 = vmatpush1.bf16.msra.mxu0 %v3489_v48  ;;  %v3578_v48 = vld [vmem:[#allocation2 + $0x46c] ss:$16 sps:$4 sm:$0xff]  }
  0x7c   :  { %1431 = vmatpush1.bf16.msra.mxu1 %v3486_v47  ;;  %1350 = vmatprep.subr.bf16.mxu0 %v3497_v50  ;;  %v3570_v47 = vld [vmem:[#allocation2 + $0x488] ss:$16 sps:$4 sm:$0xff]  }
  0x7d   :  { %1432 = vmatprep.subr.bf16.mxu1 %v3494_v49  ;;  %v3581_v49 = vld [vmem:[#allocation2 + $0x22c] ss:$16 sps:$4 sm:$0xff]   ;;  %v3576_v50 = vld [vmem:[#allocation2 + $0x468] ss:$16 sps:$4 sm:$0xff]  }
  0x7f   :  { %1351 = vmatpush2.bf16.msra.mxu0 %v3495_v52  ;;  %v3587_v52 = vld [vmem:[#allocation2 + $0x20c] ss:$16 sps:$4 sm:$0xff]  }
  0x80   :  { %1433 = vmatpush1.bf16.msra.mxu1 %v3492_v51  ;;  %1352 = vmatprep.subr.bf16.mxu0 %v3503_v55  ;;  %v3579_v51 = vld [vmem:[#allocation2 + $0x228] ss:$16 sps:$4 sm:$0xff]  }
  0x81   :  { %1434 = vmatprep.subr.bf16.mxu1 %v3500_v53  ;;  %v3582_v53 = vld [vmem:[#allocation2 + $0x448] ss:$16 sps:$4 sm:$0xff]  }
  0x82   :  { %v3585_v55 = vld [vmem:[#allocation2 + $0x208] ss:$16 sps:$4 sm:$0xff]  }
  0x83   :  { %1353 = vmatpush2.bf16.msra.mxu0 %v3501_v57  ;;  %v3593_v57 = vld [vmem:[#allocation2 + $0x3ec] ss:$16 sps:$4 sm:$0xff]  }
  0x84   :  { %1435 = vmatpush1.bf16.msra.mxu1 %v3498_v56  ;;  %1354 = vmatprep.subr.bf16.mxu0 %v3509_v59  ;;  %v3590_v56 = vld [vmem:[#allocation2 + $0x42c] ss:$16 sps:$4 sm:$0xff]   ;;  %v3591_v59 = vld [vmem:[#allocation2 + $0x3e8] ss:$16 sps:$4 sm:$0xff]  }
  0x85   :  { %1436 = vmatprep.subr.bf16.mxu1 %v3506_v58  ;;  %v3588_v58 = vld [vmem:[#allocation2 + $0x428] ss:$16 sps:$4 sm:$0xff]  }
  0x87   :  { %1355 = vmatpush2.bf16.msra.mxu0 %v3507_v61  ;;  %v3599_v61 = vld [vmem:[#allocation2 + $0x3cc] ss:$16 sps:$4 sm:$0xff]  }
  0x88   :  { %1437 = vmatpush2.bf16.msra.mxu1 %v3504_v60  ;;  %1356 = vmatprep.subr.bf16.mxu0 %v3515_v63  ;;  %v3596_v60 = vld [vmem:[#allocation2 + $0x40c] ss:$16 sps:$4 sm:$0xff]   ;;  %v3597_v63 = vld [vmem:[#allocation2 + $0x3c8] ss:$16 sps:$4 sm:$0xff]  }
  0x89   :  { %1438 = vmatprep.subr.bf16.mxu1 %v3512_v62  ;;  %v3594_v62 = vld [vmem:[#allocation2 + $0x408] ss:$16 sps:$4 sm:$0xff]  }
  0x8b   :  { %1357 = vmatpush2.bf16.msra.mxu0 %v3513_v1  ;;  %v3605_v1 = vld [vmem:[#allocation2 + $0x3ac] ss:$16 sps:$4 sm:$0xff]  }
  0x8c   :  { %1439 = vmatpush2.bf16.msra.mxu1 %v3510_v0  ;;  %1358 = vmatprep.subr.bf16.mxu0 %v3521_v3  ;;  %v3602_v0 = vld [vmem:[#allocation2 + $0x5ec] ss:$16 sps:$4 sm:$0xff]   ;;  %v3603_v3 = vld [vmem:[#allocation2 + $0x3a8] ss:$16 sps:$4 sm:$0xff]  }
  0x8d   :  { %1440 = vmatprep.subr.bf16.mxu1 %v3518_v2  ;;  %v3600_v2 = vld [vmem:[#allocation2 + $0x5e8] ss:$16 sps:$4 sm:$0xff]  }
  0x8f   :  { %1359 = vmatpush2.bf16.msra.mxu0 %v3519_v5  ;;  %v3611_v5 = vld [vmem:[#allocation2 + $0x38c] ss:$16 sps:$4 sm:$0xff]  }
  0x90   :  { %1441 = vmatpush2.bf16.msra.mxu1 %v3516_v4  ;;  %1360 = vmatprep.subr.bf16.mxu0 %v3527_v7  ;;  %v3608_v4 = vld [vmem:[#allocation2 + $0x5cc] ss:$16 sps:$4 sm:$0xff]   ;;  %v3609_v7 = vld [vmem:[#allocation2 + $0x388] ss:$16 sps:$4 sm:$0xff]  }
  0x91   :  { %1442 = vmatprep.subr.bf16.mxu1 %v3524_v6  ;;  %v3606_v6 = vld [vmem:[#allocation2 + $0x5c8] ss:$16 sps:$4 sm:$0xff]  }
  0x93   :  { %1361 = vmatpush2.bf16.msra.mxu0 %v3525_v9  ;;  %v3617_v9 = vld [vmem:[#allocation2 + $0x36c] ss:$16 sps:$4 sm:$0xff]  }
  0x94   :  { %1443 = vmatpush2.bf16.msra.mxu1 %v3522_v8  ;;  %1362 = vmatprep.subr.bf16.mxu0 %v3533_v11  ;;  %v3614_v8 = vld [vmem:[#allocation2 + $0x5ac] ss:$16 sps:$4 sm:$0xff]   ;;  %v3615_v11 = vld [vmem:[#allocation2 + $0x368] ss:$16 sps:$4 sm:$0xff]  }
  0x95   :  { %1444 = vmatprep.subr.bf16.mxu1 %v3530_v10  ;;  %v3612_v10 = vld [vmem:[#allocation2 + $0x5a8] ss:$16 sps:$4 sm:$0xff]  }
  0x97   :  { %1363 = vmatpush2.bf16.msra.mxu0 %v3531_v15  ;;  %v3623_v15 = vld [vmem:[#allocation2 + $0x34c] ss:$16 sps:$4 sm:$0xff]  }
  0x98   :  { %1445 = vmatpush2.bf16.msra.mxu1 %v3528_v14  ;;  %1364 = vmatprep.subr.bf16.mxu0 %v3539_v17  ;;  %v3620_v14 = vld [vmem:[#allocation2 + $0x58c] ss:$16 sps:$4 sm:$0xff]   ;;  %v3621_v17 = vld [vmem:[#allocation2 + $0x348] ss:$16 sps:$4 sm:$0xff]  }
  0x99   :  { %1446 = vmatprep.subr.bf16.mxu1 %v3536_v16  ;;  %v3618_v16 = vld [vmem:[#allocation2 + $0x588] ss:$16 sps:$4 sm:$0xff]  }
  0x9b   :  { %1365 = vmatpush2.bf16.msra.mxu0 %v3537_v19  ;;  %v3629_v19 = vld [vmem:[#allocation2 + $0x32c] ss:$16 sps:$4 sm:$0xff]  }
  0x9c   :  { %1447 = vmatpush2.bf16.msra.mxu1 %v3534_v18  ;;  %1463 = vmatprep.subr.bf16.mxu0 %v3545_v25  ;;  %v3626_v18 = vld [vmem:[#allocation2 + $0x56c] ss:$16 sps:$4 sm:$0xff]  }
  0x9d   :  { %1448 = vmatprep.subr.bf16.mxu1 %v3542_v24  ;;  %v3632_v24 = vld [vmem:[#allocation2 + $0x54c] ss:$16 sps:$4 sm:$0xff]  }
  0x9e   :  { %1367 = vmatmul.mubr.bf16.vlgmr.msra.gmra.mxu0 %v4047_v26  ;;  %v3635_v25 = vld [vmem:[#allocation2 + $0x30c] ss:$16 sps:$4 sm:$0xff]  }
  0x9f   :  { %1464 = vmatpush1.bf16.msra.mxu0 %v3543_v28  ;;  %1495 = vmatprep.mubr.bf16.mxu0 %v3998_v54  ;;  %v3572_v54 = vld [vmem:[#allocation2 + $0x48c] ss:$16 sps:$4 sm:$0xff]   ;;  %v3633_v28 = vld [vmem:[#allocation2 + $0x308] ss:$16 sps:$4 sm:$0xff]  }
  0xa0   :  { %1449 = vmatpush2.bf16.msra.mxu1 %v3540_v27  ;;  %1465 = vmatprep.subr.bf16.mxu0 %v3551_v30  ;;  %v3630_v27 = vld [vmem:[#allocation2 + $0x548] ss:$16 sps:$4 sm:$0xff]   ;;  %v3641_v30 = vld [vmem:[#allocation2 + $0x60c] ss:$16 sps:$4 sm:$0xff]  }
  0xa1   :  { %1450 = vmatprep.subr.bf16.mxu1 %v3548_v29  ;;  %v3638_v29 = vld [vmem:[#allocation2 + $0x52c] ss:$16 sps:$4 sm:$0xff]  }
  0xa3   :  { %1466 = vmatpush1.bf16.msra.mxu0 %v3549_v32  ;;  %v3639_v32 = vld [vmem:[#allocation2 + $0x608] ss:$16 sps:$4 sm:$0xff]  }
  0xa4   :  { %1451 = vmatpush2.bf16.msra.mxu1 %v3546_v31  ;;  %1467 = vmatprep.subr.bf16.mxu0 %v3557_v34  ;;  %v3636_v31 = vld [vmem:[#allocation2 + $0x528] ss:$16 sps:$4 sm:$0xff]   ;;  %v3647_v34 = vld [vmem:[%s4455_s2 + $0xe4] ss:$16 sps:$4 sm:$0xff]  }
  0xa5   :  { %1506 = vmatprep.subr.bf16.mxu1 %v3554_v33  ;;  %v3644_v33 = vld [vmem:[#allocation2 + $0x50c] ss:$16 sps:$4 sm:$0xff]  }
  0xa7   :  { %1453 = vmatmul.mubr.bf16.vlgmr.msra.gmra.mxu1 %v4014_v12  ;;  %1468 = vmatpush1.bf16.msra.mxu0 %v3555_v36  ;;  %v3573_v12 = vld [vmem:[#allocation2 + $0x248] ss:$16 sps:$4 sm:$0xff]   ;;  %v3645_v36 = vld [vmem:[%s4455_s2 + $0xe0] ss:$16 sps:$4 sm:$0xff]  }
  0xa8   :  { %1507 = vmatpush1.bf16.msra.mxu1 %v3552_v35  ;;  %1469 = vmatprep.subr.bf16.mxu0 %v3563_v38  ;;  %v3642_v35 = vld [vmem:[#allocation2 + $0x508] ss:$16 sps:$4 sm:$0xff]   ;;  %v3648_v38 = vld [vmem:[%s4455_s2 + $0xc0] ss:$16 sps:$4 sm:$0xff]  }
  0xa9   :  { %1508 = vmatprep.subr.bf16.mxu1 %v3560_v37  ;;  %1538 = vmatprep.mubr.bf16.mxu1 %v4038_v44  ;;  %v3584_v44 = vld [vmem:[#allocation2 + $0x44c] ss:$16 sps:$4 sm:$0xff]   ;;  %v3650_v37 = vld [vmem:[%s4455_s2 + $0xc4] ss:$16 sps:$4 sm:$0xff]  }
  0xab   :  { %1470 = vmatpush1.bf16.msra.mxu0 %v3561_v40  ;;  %v3657_v40 = vld [vmem:[%s4455_s2 + $0x60] ss:$16 sps:$4 sm:$0xff]  }
  0xac   :  { %1509 = vmatpush1.bf16.msra.mxu1 %v3558_v39  ;;  %1471 = vmatprep.subr.bf16.mxu0 %v3569_v42  ;;  %v3656_v39 = vld [vmem:[%s4455_s2 + $0x84] ss:$16 sps:$4 sm:$0xff]  }
  0xad   :  { %1510 = vmatprep.subr.bf16.mxu1 %v3566_v41  ;;  %v3699_v41 = vld [vmem:[%s4455_s2 + $0x2e0] ss:$16 sps:$4 sm:$0xff]   ;;  %v3701_v42 = vld [vmem:[%s4455_s2 + $0x2e4] ss:$16 sps:$4 sm:$0xff]  }
  0xaf   :  { %1472 = vmatpush1.bf16.msra.mxu0 %v3567_v45  ;;  %v3660_v45 = vld [vmem:[%s4455_s2 + $0x40] ss:$16 sps:$4 sm:$0xff]  }
  0xb0   :  { %1511 = vmatpush1.bf16.msra.mxu1 %v3564_v43  ;;  %1473 = vmatprep.subr.bf16.mxu0 %v3575_v46  ;;  %v3662_v43 = vld [vmem:[%s4455_s2 + $0x44] ss:$16 sps:$4 sm:$0xff]  }
  0xb1   :  { %1512 = vmatprep.subr.bf16.mxu1 %v3572_v54  ;;  %v3705_v54 = vld [vmem:[%s4455_s2 + $0x2c0] ss:$16 sps:$4 sm:$0xff]   ;;  %v3707_v46 = vld [vmem:[%s4455_s2 + $0x2c4] ss:$16 sps:$4 sm:$0xff]  }
  0xb3   :  { %1474 = vmatpush1.bf16.msra.mxu0 %v3573_v12  ;;  %v3663_v12 = vld [vmem:[%s4455_s2 + $0x20] ss:$16 sps:$4 sm:$0xff]  }
  0xb4   :  { %1513 = vmatpush1.bf16.msra.mxu1 %v3570_v47  ;;  %1475 = vmatprep.subr.bf16.mxu0 %v3581_v49  ;;  %v3665_v47 = vld [vmem:[%s4455_s2 + $0x24] ss:$16 sps:$4 sm:$0xff]  }
  0xb5   :  { %1514 = vmatprep.subr.bf16.mxu1 %v3578_v48  ;;  %v3711_v48 = vld [vmem:[%s4455_s2 + $0x2a0] ss:$16 sps:$4 sm:$0xff]   ;;  %v3713_v49 = vld [vmem:[%s4455_s2 + $0x2a4] ss:$16 sps:$4 sm:$0xff]  }
  0xb7   :  { %1476 = vmatpush1.bf16.msra.mxu0 %v3579_v51  ;;  %v3666_v51 = vld [vmem:[%s4455_s2] ss:$16 sps:$4 sm:$0xff]  }
  0xb8   :  { %1515 = vmatpush1.bf16.msra.mxu1 %v3576_v50  ;;  %1477 = vmatprep.subr.bf16.mxu0 %v3587_v52  ;;  %v3668_v50 = vld [vmem:[%s4455_s2 + $0x4] ss:$16 sps:$4 sm:$0xff]  }
  0xb9   :  { %1516 = vmatprep.subr.bf16.mxu1 %v3584_v44  ;;  %v3717_v44 = vld [vmem:[%s4455_s2 + $0x280] ss:$16 sps:$4 sm:$0xff]   ;;  %v3719_v52 = vld [vmem:[%s4455_s2 + $0x284] ss:$16 sps:$4 sm:$0xff]  }
  0xbb   :  { %1478 = vmatpush1.bf16.msra.mxu0 %v3585_v55  ;;  %v3669_v55 = vld [vmem:[%s4455_s2 + $0x1e0] ss:$16 sps:$4 sm:$0xff]  }
  0xbc   :  { %1517 = vmatpush1.bf16.msra.mxu1 %v3582_v53  ;;  %1479 = vmatprep.subr.bf16.mxu0 %v3593_v57  ;;  %v3671_v53 = vld [vmem:[%s4455_s2 + $0x1e4] ss:$16 sps:$4 sm:$0xff]  }
  0xbd   :  { %1518 = vmatprep.subr.bf16.mxu1 %v3590_v56  ;;  %v3723_v56 = vld [vmem:[%s4455_s2 + $0x260] ss:$16 sps:$4 sm:$0xff]   ;;  %v3725_v57 = vld [vmem:[%s4455_s2 + $0x264] ss:$16 sps:$4 sm:$0xff]  }
  0xbf   :  { %1480 = vmatpush2.bf16.msra.mxu0 %v3591_v59  ;;  %v3672_v59 = vld [vmem:[%s4455_s2 + $0x1c0] ss:$16 sps:$4 sm:$0xff]  }
  0xc0   :  { %1519 = vmatpush1.bf16.msra.mxu1 %v3588_v58  ;;  %1481 = vmatprep.subr.bf16.mxu0 %v3599_v61  ;;  %v3674_v58 = vld [vmem:[%s4455_s2 + $0x1c4] ss:$16 sps:$4 sm:$0xff]  }
  0xc1   :  { %1520 = vmatprep.subr.bf16.mxu1 %v3596_v60  ;;  %v3729_v60 = vld [vmem:[%s4455_s2 + $0x240] ss:$16 sps:$4 sm:$0xff]   ;;  %v3731_v61 = vld [vmem:[%s4455_s2 + $0x244] ss:$16 sps:$4 sm:$0xff]  }
  0xc3   :  { %1482 = vmatpush2.bf16.msra.mxu0 %v3597_v63  ;;  %v3675_v63 = vld [vmem:[%s4455_s2 + $0x1a0] ss:$16 sps:$4 sm:$0xff]  }
  0xc4   :  { %1521 = vmatpush1.bf16.msra.mxu1 %v3594_v62  ;;  %1483 = vmatprep.subr.bf16.mxu0 %v3605_v1  ;;  %v3677_v62 = vld [vmem:[%s4455_s2 + $0x1a4] ss:$16 sps:$4 sm:$0xff]  }
  0xc5   :  { %1522 = vmatprep.subr.bf16.mxu1 %v3602_v0  ;;  %v3735_v0 = vld [vmem:[%s4455_s2 + $0x220] ss:$16 sps:$4 sm:$0xff]   ;;  %v3737_v1 = vld [vmem:[%s4455_s2 + $0x224] ss:$16 sps:$4 sm:$0xff]  }
  0xc7   :  { %1484 = vmatpush2.bf16.msra.mxu0 %v3603_v3  ;;  %v3678_v3 = vld [vmem:[%s4455_s2 + $0x180] ss:$16 sps:$4 sm:$0xff]  }
  0xc8   :  { %1523 = vmatpush2.bf16.msra.mxu1 %v3600_v2  ;;  %1485 = vmatprep.subr.bf16.mxu0 %v3611_v5  ;;  %v3680_v2 = vld [vmem:[%s4455_s2 + $0x184] ss:$16 sps:$4 sm:$0xff]  }
  0xc9   :  { %1524 = vmatprep.subr.bf16.mxu1 %v3608_v4  ;;  %v3741_v4 = vld [vmem:[%s4455_s2 + $0x200] ss:$16 sps:$4 sm:$0xff]   ;;  %v3743_v5 = vld [vmem:[%s4455_s2 + $0x204] ss:$16 sps:$4 sm:$0xff]  }
  0xcb   :  { %1486 = vmatpush2.bf16.msra.mxu0 %v3609_v7  ;;  %v3681_v7 = vld [vmem:[%s4455_s2 + $0x160] ss:$16 sps:$4 sm:$0xff]  }
  0xcc   :  { %1525 = vmatpush2.bf16.msra.mxu1 %v3606_v6  ;;  %1487 = vmatprep.subr.bf16.mxu0 %v3617_v9  ;;  %v3683_v6 = vld [vmem:[%s4455_s2 + $0x164] ss:$16 sps:$4 sm:$0xff]  }
  0xcd   :  { %1526 = vmatprep.subr.bf16.mxu1 %v3614_v8  ;;  %v3747_v8 = vld [vmem:[%s4455_s2 + $0x3e0] ss:$16 sps:$4 sm:$0xff]   ;;  %v3749_v9 = vld [vmem:[%s4455_s2 + $0x3e4] ss:$16 sps:$4 sm:$0xff]  }
  0xcf   :  { %1488 = vmatpush2.bf16.msra.mxu0 %v3615_v11  ;;  %v3684_v11 = vld [vmem:[%s4455_s2 + $0x140] ss:$16 sps:$4 sm:$0xff]  }
  0xd0   :  { %1527 = vmatpush2.bf16.msra.mxu1 %v3612_v10  ;;  %1489 = vmatprep.subr.bf16.mxu0 %v3623_v15  ;;  %v3686_v10 = vld [vmem:[%s4455_s2 + $0x144] ss:$16 sps:$4 sm:$0xff]  }
  0xd1   :  { %1528 = vmatprep.subr.bf16.mxu1 %v3620_v14  ;;  %v3753_v14 = vld [vmem:[%s4455_s2 + $0x3c0] ss:$16 sps:$4 sm:$0xff]   ;;  %v3755_v15 = vld [vmem:[%s4455_s2 + $0x3c4] ss:$16 sps:$4 sm:$0xff]  }
  0xd3   :  { %1490 = vmatpush2.bf16.msra.mxu0 %v3621_v17  ;;  %v3687_v17 = vld [vmem:[%s4455_s2 + $0x120] ss:$16 sps:$4 sm:$0xff]  }
  0xd4   :  { %1529 = vmatpush2.bf16.msra.mxu1 %v3618_v16  ;;  %1491 = vmatprep.subr.bf16.mxu0 %v3629_v19  ;;  %v3689_v16 = vld [vmem:[%s4455_s2 + $0x124] ss:$16 sps:$4 sm:$0xff]  }
  0xd5   :  { %1530 = vmatprep.subr.bf16.mxu1 %v3626_v18  ;;  %v3759_v18 = vld [vmem:[%s4455_s2 + $0x3a0] ss:$16 sps:$4 sm:$0xff]   ;;  %v3761_v19 = vld [vmem:[%s4455_s2 + $0x3a4] ss:$16 sps:$4 sm:$0xff]  }
  0xd7   :  { %1492 = vmatpush2.bf16.msra.mxu0 %v3627_v22  ;;  %v3690_v22 = vld [vmem:[%s4455_s2 + $0x100] ss:$16 sps:$4 sm:$0xff]  }
  0xd8   :  { %1531 = vmatpush2.bf16.msra.mxu1 %v3624_v20  ;;  %1493 = vmatprep.subr.bf16.mxu0 %v3635_v25  ;;  %v3692_v20 = vld [vmem:[%s4455_s2 + $0x104] ss:$16 sps:$4 sm:$0xff]   ;;  %v3695_v25 = vld [vmem:[%s4455_s2 + $0xec] ss:$16 sps:$4 sm:$0xff]  }
  0xd9   :  { %1532 = vmatprep.subr.bf16.mxu1 %v3632_v24  ;;  %v3767_v24 = vld [vmem:[%s4455_s2 + $0x384] ss:$16 sps:$4 sm:$0xff]  }
  0xdb   :  { %1494 = vmatpush2.bf16.msra.mxu0 %v3633_v28  ;;  %v3773_v28 = vld [vmem:[%s4455_s2 + $0x364] ss:$16 sps:$4 sm:$0xff]  }
  0xdc   :  { %1533 = vmatpush2.bf16.msra.mxu1 %v3630_v27  ;;  %1563 = vmatprep.subr.bf16.mxu0 %v3641_v30  ;;  %v3765_v27 = vld [vmem:[%s4455_s2 + $0x380] ss:$16 sps:$4 sm:$0xff]   ;;  %v3779_v30 = vld [vmem:[%s4455_s2 + $0x344] ss:$16 sps:$4 sm:$0xff]  }
  0xdd   :  { %1534 = vmatprep.subr.bf16.mxu1 %v3638_v29  ;;  %v3771_v29 = vld [vmem:[%s4455_s2 + $0x360] ss:$16 sps:$4 sm:$0xff]  }
  0xde   :  { %1496 = vmatmul.mubr.bf16.vlgmr.msra.gmra.mxu0 %v4016_v13  ;;  %v3653_v13 = vld [vmem:[%s4455_s2 + $0xa4] ss:$16 sps:$4 sm:$0xff]  }
  0xdf   :  { %1564 = vmatpush1.bf16.msra.mxu0 %v3639_v32  ;;  %1581 = vmatprep.mubr.bf16.mxu0 %v3949_v21  ;;  %v3651_v21 = vld [vmem:[%s4455_s2 + $0xa0] ss:$16 sps:$4 sm:$0xff]   ;;  %v3785_v32 = vld [vmem:[%s4455_s2 + $0x324] ss:$16 sps:$4 sm:$0xff]  }
  0xe0   :  { %1535 = vmatpush2.bf16.msra.mxu1 %v3636_v31  ;;  %2372 = vmatprep.subr.bf16.mxu0 %v3647_v34  ;;  %v3777_v31 = vld [vmem:[%s4455_s2 + $0x340] ss:$16 sps:$4 sm:$0xff]   ;;  %v3788_v34 = vld [vmem:[%s4455_s2 + $0x304] ss:$16 sps:$4 sm:$0xff]  }
  0xe1   :  { %1536 = vmatprep.subr.bf16.mxu1 %v3644_v33  ;;  %v3783_v33 = vld [vmem:[%s4455_s2 + $0x320] ss:$16 sps:$4 sm:$0xff]  }
  0xe4   :  { %1537 = vmatpush2.bf16.msra.mxu1 %v3642_v35  ;;  %v3786_v35 = vld [vmem:[%s4455_s2 + $0x300] ss:$16 sps:$4 sm:$0xff]  }
  0xe5   :  { %2415 = vmatprep.subr.bf16.mxu1 %v3701_v42 }
  0xe6   :  { %3136 = vmatmul.mubr.msk.bf16.vlgmr.msra.gmra.mxu0 %vm1244_vm0, %v4027_v23  ;;  %v3654_v23 = vld [vmem:[%s4455_s2 + $0x80] ss:$16 sps:$4 sm:$0xff]  }
  0xe7   :  { %1539 = vmatmul.mubr.bf16.vlgmr.msra.gmra.mxu1 %v4047_v26  ;;  %2373 = vmatpush1.bf16.msra.mxu0 %v3645_v36  ;;  %v3659_v26 = vld [vmem:[%s4455_s2 + $0x64] ss:$16 sps:$4 sm:$0xff]   ;;  %v3791_v36 = vld [vmem:[%s4455_s2 + $0x2ec] ss:$16 sps:$4 sm:$0xff]  }
  0xe8   :  { %2374 = vmatprep.subr.bf16.mxu0 %v3650_v37  ;;  %2416 = vmatpush1.bf16.msra.mxu1 %v3699_v41 }
  0xe9   :  { %2417 = vmatprep.subr.bf16.mxu1 %v3707_v46 }
  0xeb   :  { %2375 = vmatpush1.bf16.msra.mxu0 %v3648_v38 }
  0xec   :  { %2376 = vmatprep.subr.bf16.mxu0 %v3653_v13  ;;  %2418 = vmatpush1.bf16.msra.mxu1 %v3705_v54 }
  0xed   :  { %2419 = vmatprep.subr.bf16.mxu1 %v3713_v49 }
  0xef   :  { %2377 = vmatpush1.bf16.msra.mxu0 %v3651_v21 }
  0xf0   :  { %2378 = vmatprep.subr.bf16.mxu0 %v3656_v39  ;;  %2420 = vmatpush1.bf16.msra.mxu1 %v3711_v48 }
  0xf1   :  { %2421 = vmatprep.subr.bf16.mxu1 %v3719_v52 }
  0xf3   :  { %2379 = vmatpush1.bf16.msra.mxu0 %v3654_v23 }
  0xf4   :  { %2380 = vmatprep.subr.bf16.mxu0 %v3659_v26  ;;  %2422 = vmatpush1.bf16.msra.mxu1 %v3717_v44 }
  0xf5   :  { %2423 = vmatprep.subr.bf16.mxu1 %v3725_v57 }
  0xf7   :  { %2381 = vmatpush1.bf16.msra.mxu0 %v3657_v40 }
  0xf8   :  { %2382 = vmatprep.subr.bf16.mxu0 %v3662_v43  ;;  %2424 = vmatpush1.bf16.msra.mxu1 %v3723_v56 }
  0xf9   :  { %2425 = vmatprep.subr.bf16.mxu1 %v3731_v61 }
  0xfb   :  { %2383 = vmatpush1.bf16.msra.mxu0 %v3660_v45 }
  0xfc   :  { %2384 = vmatprep.subr.bf16.mxu0 %v3665_v47  ;;  %2426 = vmatpush1.bf16.msra.mxu1 %v3729_v60 }
  0xfd   :  { %2427 = vmatprep.subr.bf16.mxu1 %v3737_v1  ;;  %v3693_v1 = vld [vmem:[%s4455_s2 + $0xe8] ss:$16 sps:$4 sm:$0xff]  }
  0xff   :  { %2385 = vmatpush1.bf16.msra.mxu0 %v3663_v12 }
 0x100   :  { %2386 = vmatprep.subr.bf16.mxu0 %v3668_v50  ;;  %2428 = vmatpush1.bf16.msra.mxu1 %v3735_v0 }
 0x101   :  { %2429 = vmatprep.subr.bf16.mxu1 %v3743_v5  ;;  %v3704_v5 = vld [vmem:[%s4455_s2 + $0xac] ss:$16 sps:$4 sm:$0xff]  }
 0x103   :  { %2387 = vmatpush1.bf16.msra.mxu0 %v3666_v51 }
 0x104   :  { %2388 = vmatprep.subr.bf16.mxu0 %v3671_v53  ;;  %2430 = vmatpush1.bf16.msra.mxu1 %v3741_v4  ;;  %v3696_v4 = vld [vmem:[%s4455_s2 + $0xc8] ss:$16 sps:$4 sm:$0xff]  }
 0x105   :  { %2431 = vmatprep.subr.bf16.mxu1 %v3749_v9  ;;  %v3716_v9 = vld [vmem:[%s4455_s2 + $0x6c] ss:$16 sps:$4 sm:$0xff]  }
 0x107   :  { %2389 = vmatpush2.bf16.msra.mxu0 %v3669_v55 }
 0x108   :  { %2390 = vmatprep.subr.bf16.mxu0 %v3674_v58  ;;  %2432 = vmatpush2.bf16.msra.mxu1 %v3747_v8  ;;  %v3708_v8 = vld [vmem:[%s4455_s2 + $0x88] ss:$16 sps:$4 sm:$0xff]  }
 0x109   :  { %2433 = vmatprep.subr.bf16.mxu1 %v3755_v15  ;;  %v3728_v15 = vld [vmem:[%s4455_s2 + $0x2c] ss:$16 sps:$4 sm:$0xff]  }
 0x10b   :  { %2391 = vmatpush2.bf16.msra.mxu0 %v3672_v59 }
 0x10c   :  { %2392 = vmatprep.subr.bf16.mxu0 %v3677_v62  ;;  %2434 = vmatpush2.bf16.msra.mxu1 %v3753_v14  ;;  %v3720_v14 = vld [vmem:[%s4455_s2 + $0x48] ss:$16 sps:$4 sm:$0xff]  }
 0x10d   :  { %2435 = vmatprep.subr.bf16.mxu1 %v3761_v19  ;;  %v3740_v19 = vld [vmem:[%s4455_s2 + $0x1ec] ss:$16 sps:$4 sm:$0xff]  }
 0x10f   :  { %2393 = vmatpush2.bf16.msra.mxu0 %v3675_v63 }
 0x110   :  { %2394 = vmatprep.subr.bf16.mxu0 %v3680_v2  ;;  %2436 = vmatpush2.bf16.msra.mxu1 %v3759_v18  ;;  %v3732_v18 = vld [vmem:[%s4455_s2 + $0x8] ss:$16 sps:$4 sm:$0xff]  }
 0x111   :  { %2437 = vmatprep.subr.bf16.mxu1 %v3767_v24  ;;  %v3744_v24 = vld [vmem:[%s4455_s2 + $0x1c8] ss:$16 sps:$4 sm:$0xff]  }
 0x113   :  { %2395 = vmatpush2.bf16.msra.mxu0 %v3678_v3  ;;  %v3698_v3 = vld [vmem:[%s4455_s2 + $0xcc] ss:$16 sps:$4 sm:$0xff]  }
 0x114   :  { %2396 = vmatprep.subr.bf16.mxu0 %v3683_v6  ;;  %2438 = vmatpush2.bf16.msra.mxu1 %v3765_v27  ;;  %v3702_v6 = vld [vmem:[%s4455_s2 + $0xa8] ss:$16 sps:$4 sm:$0xff]  }
 0x115   :  { %2439 = vmatprep.subr.bf16.mxu1 %v3773_v28  ;;  %v3750_v27 = vld [vmem:[%s4455_s2 + $0x1a8] ss:$16 sps:$4 sm:$0xff]   ;;  %v3758_v28 = vld [vmem:[%s4455_s2 + $0x18c] ss:$16 sps:$4 sm:$0xff]  }
 0x117   :  { %2397 = vmatpush2.bf16.msra.mxu0 %v3681_v7  ;;  %v3710_v7 = vld [vmem:[%s4455_s2 + $0x8c] ss:$16 sps:$4 sm:$0xff]  }
 0x118   :  { %2398 = vmatprep.subr.bf16.mxu0 %v3686_v10  ;;  %2440 = vmatpush2.bf16.msra.mxu1 %v3771_v29  ;;  %v3714_v10 = vld [vmem:[%s4455_s2 + $0x68] ss:$16 sps:$4 sm:$0xff]  }
 0x119   :  { %2441 = vmatprep.subr.bf16.mxu1 %v3779_v30  ;;  %v3756_v29 = vld [vmem:[%s4455_s2 + $0x188] ss:$16 sps:$4 sm:$0xff]  }
 0x11b   :  { %2399 = vmatpush2.bf16.msra.mxu0 %v3684_v11  ;;  %v3722_v11 = vld [vmem:[%s4455_s2 + $0x4c] ss:$16 sps:$4 sm:$0xff]  }
 0x11c   :  { %2400 = vmatprep.subr.bf16.mxu0 %v3689_v16  ;;  %2442 = vmatpush2.bf16.msra.mxu1 %v3777_v31  ;;  %v3726_v16 = vld [vmem:[%s4455_s2 + $0x28] ss:$16 sps:$4 sm:$0xff]   ;;  %v3764_v31 = vld [vmem:[%s4455_s2 + $0x16c] ss:$16 sps:$4 sm:$0xff]  }
 0x11d   :  { %2443 = vmatprep.subr.bf16.mxu1 %v3785_v32  ;;  %v3762_v32 = vld [vmem:[%s4455_s2 + $0x168] ss:$16 sps:$4 sm:$0xff]  }
 0x11e   :  { %v1282_v13 = vpop.f32.mrf.mxu0 }
 0x11f   :  { %2401 = vmatpush2.bf16.msra.mxu0 %v3687_v17  ;;  %v1325_v37 = vpop.f32.mrf.mxu1  ;;  %v3734_v17 = vld [vmem:[%s4455_s2 + $0xc] ss:$16 sps:$4 sm:$0xff]  }
 0x120   :  { %2402 = vmatprep.subr.bf16.mxu0 %v3692_v20  ;;  %2444 = vmatpush2.bf16.msra.mxu1 %v3783_v33  ;;  %v1284_v39 = vpop.f32.mrf.mxu0  ;;  %v1326_v54 = vadd.f32 %v1325_v37, %v1282_v13  ;;  %v3738_v20 = vld [vmem:[%s4455_s2 + $0x1e8] ss:$16 sps:$4 sm:$0xff]   ;;  %v3776_v13 = vld [vmem:[%s4455_s2 + $0x12c] ss:$16 sps:$4 sm:$0xff]  }
 0x121   :  { %2445 = vmatprep.subr.bf16.mxu1 %v3788_v34  ;;  %v1327_v38 = vpop.f32.mrf.mxu1  ;;  %v3770_v34 = vld [vmem:[%s4455_s2 + $0x14c] ss:$16 sps:$4 sm:$0xff]  }
 0x122   :  { %v1286_v26 = vpop.f32.mrf.mxu0  ;;  %v1328_v45 = vadd.f32 %v1327_v38, %v1284_v39  ;;  %v3774_v39 = vld [vmem:[%s4455_s2 + $0x128] ss:$16 sps:$4 sm:$0xff]  }
 0x123   :  { %2403 = vmatpush2.bf16.msra.mxu0 %v3690_v22  ;;  %v1329_v21 = vpop.f32.mrf.mxu1  ;;  %v3746_v22 = vld [vmem:[%s4455_s2 + $0x1cc] ss:$16 sps:$4 sm:$0xff]  }
 0x124   :  { %2458 = vmatprep.subr.bf16.mxu0 %v3695_v25  ;;  %2446 = vmatpush2.bf16.msra.mxu1 %v3786_v35  ;;  %v1288_v41 = vpop.f32.mrf.mxu0  ;;  %v1330_v47 = vadd.f32 %v1329_v21, %v1286_v26  ;;  %v3752_v25 = vld [vmem:[%s4455_s2 + $0x1ac] ss:$16 sps:$4 sm:$0xff]  }
 0x125   :  { %2501 = vmatprep.subr.bf16.mxu1 %v3791_v36  ;;  %v1331_v23 = vpop.f32.mrf.mxu1  ;;  %v3768_v36 = vld [vmem:[%s4455_s2 + $0x148] ss:$16 sps:$4 sm:$0xff]  }
 0x126   :  { %v1332_v51 = vadd.f32 %v1331_v23, %v1288_v41 }
 0x127   :  { %v1411_v40 = vpop.f32.mrf.mxu1 }
 0x129   :  { %v1413_v42 = vpop.f32.mrf.mxu1 }
 0x12b   :  { %v1415_v48 = vpop.f32.mrf.mxu1 }
 0x12d   :  { %v1417_v57 = vpop.f32.mrf.mxu1 }
 0x15e   :  { %v1368_v43 = vpop.f32.mrf.mxu0 }
 0x15f   :  { %v1369_v49 = vadd.f32 %v1368_v43, %v1326_v54 }
 0x160   :  { %v1370_v46 = vpop.f32.mrf.mxu0 }
 0x161   :  { %v1371_v12 = vadd.f32 %v1370_v46, %v1328_v45  ;;  %v1412_v58 = vadd.f32 %v1411_v40, %v1369_v49  ;;  %v3782_v40 = vld [vmem:[%s4455_s2 + $0x10c] ss:$16 sps:$4 sm:$0xff]   ;;  %v3780_v45 = vld [vmem:[%s4455_s2 + $0x108] ss:$16 sps:$4 sm:$0xff]  }
 0x162   :  { %v1372_v50 = vpop.f32.mrf.mxu0 }
 0x163   :  { %v1373_v44 = vadd.f32 %v1372_v50, %v1330_v47  ;;  %v1414_v53 = vadd.f32 %v1413_v42, %v1371_v12  ;;  %v1592_v63 = vmax.f32 %v1412_v58, 0.0 }
 0x164   :  { %v1374_v52 = vpop.f32.mrf.mxu0 }
 0x165   :  { %v1416_v55 = vadd.f32 %v1415_v48, %v1373_v44  ;;  %v1375_v56 = vadd.f32 %v1374_v52, %v1332_v51  ;;  %v1593_v61 = vmax.f32 %v1414_v53, 0.0 }
 0x167   :  { %v1418_v59 = vadd.f32 %v1417_v57, %v1375_v56  ;;  %v1596_v60 = vmax.f32 %v1416_v55, 0.0  ;;  %v1454_v30 = vpop.f32.mrf.mxu1 }
 0x169   :  { %v1597_v62 = vmax.f32 %v1418_v59, 0.0  ;;  %v4259_v2 = vpack.c.bf16 %v1596_v60, %v1592_v63  ;;  %v1456_v33 = vpop.f32.mrf.mxu1 }
 0x16b   :  { %v1601_v0 = vpack.c.bf16 %v1597_v62, %v1593_v61  ;;  %v1458_v37 = vpop.f32.mrf.mxu1 }
 0x16d   :  { %2404 = vmatprep.mubr.bf16.mxu0 %v1601_v0  ;;  %v1460_v23 = vpop.f32.mrf.mxu1 }
 0x16e   :  { %2405 = vmatmul.mubr.bf16.vlgmr.msra.gmra.mxu0 %v4259_v2 }
 0x16f   :  { %2459 = vmatpush1.bf16.msra.mxu0 %v3693_v1  ;;  %2490 = vmatprep.mubr.bf16.mxu0 %v1601_v0 }
 0x170   :  { %2460 = vmatprep.subr.bf16.mxu0 %v3698_v3  ;;  %v3789_v3 = vld [vmem:[%s4455_s2 + $0x2e8] ss:$16 sps:$4 sm:$0xff]  }
 0x173   :  { %2461 = vmatpush1.bf16.msra.mxu0 %v3696_v4 }
 0x174   :  { %2462 = vmatprep.subr.bf16.mxu0 %v3704_v5  ;;  %v3794_v5 = vld [vmem:[%s4455_s2 + $0x2cc] ss:$16 sps:$4 sm:$0xff]  }
 0x177   :  { %2463 = vmatpush1.bf16.msra.mxu0 %v3702_v6  ;;  %v3837_v6 = vld [vmem:[#allocation5 + $0x78] sm:$0xff]  }
 0x178   :  { %2464 = vmatprep.subr.bf16.mxu0 %v3710_v7  ;;  %v3838_v7 = vld [vmem:[#allocation5 + $0x38] sm:$0xff]  }
 0x17b   :  { %2465 = vmatpush1.bf16.msra.mxu0 %v3708_v8  ;;  %v3792_v8 = vld [vmem:[%s4455_s2 + $0x2c8] ss:$16 sps:$4 sm:$0xff]  }
 0x17c   :  { %2466 = vmatprep.subr.bf16.mxu0 %v3716_v9  ;;  %v3797_v9 = vld [vmem:[%s4455_s2 + $0x2ac] ss:$16 sps:$4 sm:$0xff]  }
 0x17f   :  { %2467 = vmatpush1.bf16.msra.mxu0 %v3714_v10  ;;  %v3840_v10 = vld [vmem:[#allocation5 + $0x30] sm:$0xff]  }
 0x180   :  { %2468 = vmatprep.subr.bf16.mxu0 %v3722_v11  ;;  %v3841_v11 = vld [vmem:[#allocation5 + $0x68] sm:$0xff]  }
 0x183   :  { %2469 = vmatpush1.bf16.msra.mxu0 %v3720_v14  ;;  %v3795_v14 = vld [vmem:[%s4455_s2 + $0x2a8] ss:$16 sps:$4 sm:$0xff]  }
 0x184   :  { %2470 = vmatprep.subr.bf16.mxu0 %v3728_v15  ;;  %v3800_v15 = vld [vmem:[%s4455_s2 + $0x28c] ss:$16 sps:$4 sm:$0xff]  }
 0x187   :  { %2471 = vmatpush1.bf16.msra.mxu0 %v3726_v16  ;;  %v3842_v16 = vld [vmem:[#allocation5 + $0x28] sm:$0xff]  }
 0x188   :  { %2472 = vmatprep.subr.bf16.mxu0 %v3734_v17  ;;  %v3798_v17 = vld [vmem:[%s4455_s2 + $0x288] ss:$16 sps:$4 sm:$0xff]  }
 0x18b   :  { %2473 = vmatpush1.bf16.msra.mxu0 %v3732_v18  ;;  %v3803_v18 = vld [vmem:[%s4455_s2 + $0x26c] ss:$16 sps:$4 sm:$0xff]  }
 0x18c   :  { %2474 = vmatprep.subr.bf16.mxu0 %v3740_v19  ;;  %v3801_v19 = vld [vmem:[%s4455_s2 + $0x268] ss:$16 sps:$4 sm:$0xff]  }
 0x18f   :  { %2475 = vmatpush2.bf16.msra.mxu0 %v3738_v20  ;;  %v3806_v20 = vld [vmem:[%s4455_s2 + $0x24c] ss:$16 sps:$4 sm:$0xff]  }
 0x190   :  { %2476 = vmatprep.subr.bf16.mxu0 %v3746_v22  ;;  %v3804_v22 = vld [vmem:[%s4455_s2 + $0x248] ss:$16 sps:$4 sm:$0xff]  }
 0x193   :  { %2477 = vmatpush2.bf16.msra.mxu0 %v3744_v24  ;;  %v3809_v24 = vld [vmem:[%s4455_s2 + $0x22c] ss:$16 sps:$4 sm:$0xff]  }
 0x194   :  { %2478 = vmatprep.subr.bf16.mxu0 %v3752_v25  ;;  %v3807_v25 = vld [vmem:[%s4455_s2 + $0x228] ss:$16 sps:$4 sm:$0xff]  }
 0x197   :  { %2479 = vmatpush2.bf16.msra.mxu0 %v3750_v27  ;;  %v3812_v27 = vld [vmem:[%s4455_s2 + $0x20c] ss:$16 sps:$4 sm:$0xff]  }
 0x198   :  { %2480 = vmatprep.subr.bf16.mxu0 %v3758_v28  ;;  %v3810_v28 = vld [vmem:[%s4455_s2 + $0x208] ss:$16 sps:$4 sm:$0xff]  }
 0x19b   :  { %2481 = vmatpush2.bf16.msra.mxu0 %v3756_v29  ;;  %v3815_v29 = vld [vmem:[%s4455_s2 + $0x3ec] ss:$16 sps:$4 sm:$0xff]  }
 0x19c   :  { %2482 = vmatprep.subr.bf16.mxu0 %v3764_v31  ;;  %v3818_v31 = vld [vmem:[%s4455_s2 + $0x3cc] ss:$16 sps:$4 sm:$0xff]  }
 0x19e   :  { %v1497_v35 = vpop.f32.mrf.mxu0 }
 0x19f   :  { %2483 = vmatpush2.bf16.msra.mxu0 %v3762_v32  ;;  %v1498_v54 = vadd.f32 %v1497_v35, %v1454_v30  ;;  %v3813_v30 = vld [vmem:[%s4455_s2 + $0x3e8] ss:$16 sps:$4 sm:$0xff]   ;;  %v3824_v35 = vld [vmem:[%s4455_s2 + $0x38c] ss:$16 sps:$4 sm:$0xff]  }
 0x1a0   :  { %v1499_v38 = vpop.f32.mrf.mxu0  ;;  %2484 = vmatprep.subr.bf16.mxu0 %v3770_v34  ;;  %v3816_v32 = vld [vmem:[%s4455_s2 + $0x3c8] ss:$16 sps:$4 sm:$0xff]  }
 0x1a1   :  { %v1500_v43 = vadd.f32 %v1499_v38, %v1456_v33  ;;  %v3821_v33 = vld [vmem:[%s4455_s2 + $0x3ac] ss:$16 sps:$4 sm:$0xff]   ;;  %v3819_v34 = vld [vmem:[%s4455_s2 + $0x3a8] ss:$16 sps:$4 sm:$0xff]  }
 0x1a2   :  { %v1501_v21 = vpop.f32.mrf.mxu0  ;;  %v3825_v38 = vld [vmem:[%s4455_s2 + $0x368] ss:$16 sps:$4 sm:$0xff]  }
 0x1a3   :  { %2485 = vmatpush2.bf16.msra.mxu0 %v3768_v36  ;;  %v1502_v12 = vadd.f32 %v1501_v21, %v1458_v37  ;;  %v3822_v36 = vld [vmem:[%s4455_s2 + $0x388] ss:$16 sps:$4 sm:$0xff]   ;;  %v3827_v37 = vld [vmem:[%s4455_s2 + $0x36c] ss:$16 sps:$4 sm:$0xff]  }
 0x1a4   :  { %v1503_v26 = vpop.f32.mrf.mxu0  ;;  %2486 = vmatprep.subr.bf16.mxu0 %v3776_v13  ;;  %v3830_v13 = vld [vmem:[%s4455_s2 + $0x34c] ss:$16 sps:$4 sm:$0xff]   ;;  %v3828_v21 = vld [vmem:[%s4455_s2 + $0x348] ss:$16 sps:$4 sm:$0xff]  }
 0x1a5   :  { %v1504_v44 = vadd.f32 %v1503_v26, %v1460_v23  ;;  %v3831_v23 = vld [vmem:[%s4455_s2 + $0x328] ss:$16 sps:$4 sm:$0xff]   ;;  %v3836_v26 = vld [vmem:[%s4455_s2 + $0x30c] ss:$16 sps:$4 sm:$0xff]  }
 0x1a6   :  { %v1583_v42 = vpop.f32.mrf.mxu0 }
 0x1a7   :  { %v1540_v41 = vpop.f32.mrf.mxu1  ;;  %2487 = vmatpush2.bf16.msra.mxu0 %v3774_v39  ;;  %v3833_v39 = vld [vmem:[%s4455_s2 + $0x32c] ss:$16 sps:$4 sm:$0xff]  }
 0x1a8   :  { %v1585_v47 = vpop.f32.mrf.mxu0  ;;  %2488 = vmatprep.subr.bf16.mxu0 %v3782_v40  ;;  %v1541_v49 = vadd.f32 %v1540_v41, %v1498_v54  ;;  %v3834_v40 = vld [vmem:[%s4455_s2 + $0x308] ss:$16 sps:$4 sm:$0xff]   ;;  %v3843_v41 = vld [vmem:[#allocation5 + $0x60] sm:$0xff]   ;;  %v3847_v54 = vld [vmem:[#allocation5 + $0x50] sm:$0xff]   ;;  %s3950_s2 = smov [#allocation7]  }
 0x1a9   :  { %v1542_v46 = vpop.f32.mrf.mxu1  ;;  %s2926_s24 = sshll.u32 %s3950_s2, 4  ;;  %s2927_s24 = int_to_ptr.vmem [resolvable:$true] %s2926_s24 }
 0x1aa   :  { %v1543_v48 = vadd.f32 %v1542_v46, %v1500_v43  ;;  %v1587_v51 = vpop.f32.mrf.mxu0  ;;  %v1584_v59 = vadd.f32 %v1583_v42, %v1541_v49  ;;  %v3844_v42 = vld [vmem:[#allocation5 + $0x20] sm:$0xff]   ;;  %v3845_v43 = vld [vmem:[#allocation5 + $0x58] sm:$0xff]   ;;  %v3848_v46 = vld [vmem:[#allocation5 + $0x10] sm:$0xff]   ;;  %s3917_s25 = scalar_lea.vmem %s2927_s24, 256  ;;  %p3922_p11 = scmp.lt.s32.totalorder %s2927_s24, %s2927_s24 }
 0x1ab   :  { %v1544_v50 = vpop.f32.mrf.mxu1  ;;  %2489 = vmatpush2.bf16.msra.mxu0 %v3780_v45  ;;  %v3846_v45 = vld [vmem:[#allocation5 + $0x18] sm:$0xff]   ;;  %v3852_v49 = vld [vmem:[#allocation5] sm:$0xff]   ;;  %p3918_p10 = scmp.ne.s32.totalorder %s2927_s24, %s3917_s25  ;;  %p3923_p12 = scmp.lt.s32.totalorder %s3917_s25, %s3917_s25 }
 0x1ac   :  { %v1545_v52 = vadd.f32 %v1544_v50, %v1502_v12  ;;  %v1589_v55 = vpop.f32.mrf.mxu0  ;;  %v1586_v56 = vadd.f32 %v1585_v47, %v1543_v48  ;;  %v1594_v0 = vmax.f32 %v1584_v59, 0.0  ;;  %3297 = vmatprep.subr.bf16.mxu0 %v3837_v6  ;;  %v3849_v47 = vld [vmem:[#allocation5 + $0x48] sm:$0xff]   ;;  %v3851_v48 = vld [vmem:[#allocation5 + $0x40] sm:$0xff]   ;;  %v3853_v50 = vld [vmem:[#allocation5 + $0xf8] sm:$0xff]  }
 0x1ad   :  { %v1546_v53 = vpop.f32.mrf.mxu1  ;;  %v3850_v12 = vld [vmem:[#allocation5 + $0x8] sm:$0xff]   ;;  %v3862_v59 = vld [vmem:[#allocation5 + $0x98] sm:$0xff]   ;;  %p3924_p13 = por %p3923_p12, %p3922_p11 }
 0x1ae   :  { %v1588_v57 = vadd.f32 %v1587_v51, %v1545_v52  ;;  %v1547_v58 = vadd.f32 %v1546_v53, %v1504_v44  ;;  %2491 = vmatmul.mubr.bf16.vlgmr.msra.gmra.mxu0 %v4259_v2  ;;  %v1595_v62 = vmax.f32 %v1586_v56, 0.0  ;;  %v3839_v2 = vld [vmem:[#allocation5 + $0x70] sm:$0xff]   ;;  %v3854_v51 = vld [vmem:[#allocation5 + $0xb8] sm:$0xff]   ;;  %v3857_v53 = vld [vmem:[#allocation5 + $0xe8] sm:$0xff]  }
 0x1af   :  { %3298 = vmatpush3.bf16.msra.mxu0 %v3838_v7  ;;  %v3855_v44 = vld [vmem:[#allocation5 + $0xf0] sm:$0xff]   ;;  %v3859_v56 = vld [vmem:[#allocation5 + $0xe0] sm:$0xff]   ;;  %p3925_p0 = pnand %p3924_p13, %p3918_p10 }
 0x1b0   :  { %v1590_v60 = vadd.f32 %v1589_v55, %v1547_v58  ;;  %v1598_v61 = vmax.f32 %v1588_v57, 0.0  ;;  %3299 = vmatprep.subr.bf16.mxu0 %v3839_v2  ;;  %v3856_v52 = vld [vmem:[#allocation5 + $0xb0] sm:$0xff]   ;;  %v3858_v55 = vld [vmem:[#allocation5 + $0xa8] sm:$0xff]   ;;  %v3860_v57 = vld [vmem:[#allocation5 + $0xa0] sm:$0xff]  }
 0x1b1   :  { %v3861_v58 = vld [vmem:[#allocation5 + $0xd8] sm:$0xff]  }
 0x1b2   :  { %v1599_v63 = vmax.f32 %v1590_v60, 0.0  ;;  %v4356_v4 = vpack.c.bf16 %v1598_v61, %v1594_v0  ;;  %v3863_v60 = vld [vmem:[#allocation5 + $0xd0] sm:$0xff]   ;;  %v3867_v0 = vld [vmem:[#allocation5 + $0xc0] sm:$0xff]  }
 0x1b3   :  { %3300 = vmatpush3.bf16.msra.mxu0 %v3840_v10  ;;  %v3864_v61 = vld [vmem:[#allocation5 + $0x90] sm:$0xff]  }
 0x1b4   :  { %v1603_v1 = vpack.c.bf16 %v1599_v63, %v1595_v62  ;;  %3301 = vmatprep.subr.bf16.mxu0 %v3841_v11  ;;  %v3865_v62 = vld [vmem:[#allocation5 + $0xc8] sm:$0xff]  }
 0x1b5   :  { %v3866_v63 = vld [vmem:[#allocation5 + $0x88] sm:$0xff]  }
 0x1b6   :  { %2447 = vmatprep.mubr.bf16.mxu1 %v1603_v1 }
 0x1b7   :  { %2448 = vmatmul.mubr.bf16.vlgmr.msra.gmra.mxu1 %v4356_v4  ;;  %3302 = vmatpush3.bf16.msra.mxu0 %v3842_v16 }
 0x1b8   :  { %2502 = vmatpush1.bf16.msra.mxu1 %v3789_v3  ;;  %2533 = vmatprep.mubr.bf16.mxu1 %v1603_v1  ;;  %v3868_v1 = vld [vmem:[#allocation5 + $0x80] sm:$0xff]  }
 0x1b9   :  { %2503 = vmatprep.subr.bf16.mxu1 %v3794_v5  ;;  %3303 = vmatprep.subr.bf16.mxu0 %v3843_v41  ;;  %v2894_v41 = vlaneseq }
 0x1bb   :  { %3304 = vmatpush3.bf16.msra.mxu0 %v3844_v42 }
 0x1bc   :  { %2504 = vmatpush1.bf16.msra.mxu1 %v3792_v8  ;;  %3305 = vmatprep.subr.bf16.mxu0 %v3845_v43 }
 0x1bd   :  { %2505 = vmatprep.subr.bf16.mxu1 %v3797_v9 }
 0x1bf   :  { %3306 = vmatpush3.bf16.msra.mxu0 %v3846_v45  ;;  %v2895_v45 = vand.u32 127, %v2894_v41 }
 0x1c0   :  { %2506 = vmatpush1.bf16.msra.mxu1 %v3795_v14  ;;  %3307 = vmatprep.subr.bf16.mxu0 %v3847_v54 }
 0x1c1   :  { %2507 = vmatprep.subr.bf16.mxu1 %v3800_v15  ;;  %vm2896_vm1 = vcmp.lt.s32.totalorder %v2895_v45, 10 }
 0x1c3   :  { %3308 = vmatpush3.bf16.msra.mxu0 %v3848_v46 }
 0x1c4   :  { %2508 = vmatpush1.bf16.msra.mxu1 %v3798_v17  ;;  %3309 = vmatprep.subr.bf16.mxu0 %v3849_v47 }
 0x1c5   :  { %2509 = vmatprep.subr.bf16.mxu1 %v3803_v18 }
 0x1c7   :  { %3310 = vmatpush3.bf16.msra.mxu0 %v3850_v12 }
 0x1c8   :  { %2510 = vmatpush1.bf16.msra.mxu1 %v3801_v19  ;;  %3311 = vmatprep.subr.bf16.mxu0 %v3851_v48 }
 0x1c9   :  { %2511 = vmatprep.subr.bf16.mxu1 %v3806_v20 }
 0x1cb   :  { %3312 = vmatpush3.bf16.msra.mxu0 %v3852_v49 }
 0x1cc   :  { %2512 = vmatpush1.bf16.msra.mxu1 %v3804_v22 }
 0x1cd   :  { %2513 = vmatprep.subr.bf16.mxu1 %v3809_v24 }
 0x1d0   :  { %2514 = vmatpush1.bf16.msra.mxu1 %v3807_v25 }
 0x1d1   :  { %2515 = vmatprep.subr.bf16.mxu1 %v3812_v27 }
 0x1d4   :  { %2516 = vmatpush1.bf16.msra.mxu1 %v3810_v28 }
 0x1d5   :  { %2517 = vmatprep.subr.bf16.mxu1 %v3815_v29 }
 0x1d8   :  { %2518 = vmatpush2.bf16.msra.mxu1 %v3813_v30 }
 0x1d9   :  { %2519 = vmatprep.subr.bf16.mxu1 %v3818_v31 }
 0x1dc   :  { %2520 = vmatpush2.bf16.msra.mxu1 %v3816_v32 }
 0x1dd   :  { %2521 = vmatprep.subr.bf16.mxu1 %v3821_v33 }
 0x1e0   :  { %2522 = vmatpush2.bf16.msra.mxu1 %v3819_v34 }
 0x1e1   :  { %2523 = vmatprep.subr.bf16.mxu1 %v3824_v35 }
 0x1e4   :  { %2524 = vmatpush2.bf16.msra.mxu1 %v3822_v36 }
 0x1e5   :  { %2525 = vmatprep.subr.bf16.mxu1 %v3827_v37 }
 0x1e8   :  { %2526 = vmatpush2.bf16.msra.mxu1 %v3825_v38 }
 0x1e9   :  { %2527 = vmatprep.subr.bf16.mxu1 %v3830_v13 }
 0x1ec   :  { %2528 = vmatpush2.bf16.msra.mxu1 %v3828_v21 }
 0x1ed   :  { %2529 = vmatprep.subr.bf16.mxu1 %v3833_v39 }
 0x1f0   :  { %2530 = vmatpush2.bf16.msra.mxu1 %v3831_v23 }
 0x1f1   :  { %2531 = vmatprep.subr.bf16.mxu1 %v3836_v26 }
 0x1f4   :  { %2532 = vmatpush2.bf16.msra.mxu1 %v3834_v40 }
 0x1f5   :  { %3319 = vmatprep.subr.bf16.mxu1 %v3853_v50 }
 0x1f7   :  { %2534 = vmatmul.mubr.bf16.vlgmr.msra.gmra.mxu1 %v4356_v4 }
 0x1f8   :  { %3320 = vmatpush3.bf16.msra.mxu1 %v3854_v51 }
 0x1f9   :  { %3321 = vmatprep.subr.bf16.mxu1 %v3855_v44 }
 0x1fc   :  { %3322 = vmatpush3.bf16.msra.mxu1 %v3856_v52 }
 0x1fd   :  { %3323 = vmatprep.subr.bf16.mxu1 %v3857_v53 }
 0x200   :  { %3324 = vmatpush3.bf16.msra.mxu1 %v3858_v55 }
 0x201   :  { %3325 = vmatprep.subr.bf16.mxu1 %v3859_v56 }
 0x204   :  { %3326 = vmatpush3.bf16.msra.mxu1 %v3860_v57 }
 0x205   :  { %3327 = vmatprep.subr.bf16.mxu1 %v3861_v58 }
 0x208   :  { %3328 = vmatpush3.bf16.msra.mxu1 %v3862_v59 }
 0x209   :  { %3329 = vmatprep.subr.bf16.mxu1 %v3863_v60 }
 0x20c   :  { %3330 = vmatpush3.bf16.msra.mxu1 %v3864_v61 }
 0x20d   :  { %3331 = vmatprep.subr.bf16.mxu1 %v3865_v62 }
 0x210   :  { %3332 = vmatpush3.bf16.msra.mxu1 %v3866_v63 }
 0x211   :  { %3333 = vmatprep.subr.bf16.mxu1 %v3867_v0 }
 0x214   :  { %3334 = vmatpush3.bf16.msra.mxu1 %v3868_v1 }
 0x22e   :  { %v2406_v3 = vpop.f32.mrf.mxu0 }
 0x230   :  { %v2408_v4 = vpop.f32.mrf.mxu0 }
 0x232   :  { %v2410_v6 = vpop.f32.mrf.mxu0 }
 0x234   :  { %v2412_v10 = vpop.f32.mrf.mxu0 }
 0x26e   :  { %v2492_v24 = vpop.f32.mrf.mxu0 }
 0x270   :  { %v2494_v25 = vpop.f32.mrf.mxu0 }
 0x272   :  { %v2496_v28 = vpop.f32.mrf.mxu0 }
 0x274   :  { %v2498_v33 = vpop.f32.mrf.mxu0 }
 0x277   :  { %v2449_v5 = vpop.f32.mrf.mxu1 }
 0x278   :  { %v2450_v11 = vadd.f32 %v2449_v5, %v2406_v3 }
 0x279   :  { %v2451_v7 = vpop.f32.mrf.mxu1 }
 0x27a   :  { %v2452_v8 = vadd.f32 %v2451_v7, %v2408_v4  ;;  %v2544_v19 = vmax.f32 %v2450_v11, 0.0 }
 0x27b   :  { %v2453_v2 = vpop.f32.mrf.mxu1 }
 0x27c   :  { %v2454_v9 = vadd.f32 %v2453_v2, %v2410_v6  ;;  %v2545_v17 = vmax.f32 %v2452_v8, 0.0 }
 0x27d   :  { %v2455_v14 = vpop.f32.mrf.mxu1 }
 0x27e   :  { %v2456_v15 = vadd.f32 %v2455_v14, %v2412_v10  ;;  %v2548_v16 = vmax.f32 %v2454_v9, 0.0 }
 0x280   :  { %v2549_v18 = vmax.f32 %v2456_v15, 0.0  ;;  %v2552_v22 = vpack.c.bf16 %v2548_v16, %v2544_v19 }
 0x282   :  { %v2553_v20 = vpack.c.bf16 %v2549_v18, %v2545_v17 }
 0x284   :  { %2844 = vmatprep.mubr.bf16.mxu0 %v2553_v20 }
 0x285   :  { %2845 = vmatmul.mubr.bf16.vlgmr.msra.gmra.mxu0 %v2552_v22 }
 0x2b7   :  { %v2535_v27 = vpop.f32.mrf.mxu1 }
 0x2b8   :  { %v2536_v34 = vadd.f32 %v2535_v27, %v2492_v24 }
 0x2b9   :  { %v2537_v29 = vpop.f32.mrf.mxu1 }
 0x2ba   :  { %v2538_v31 = vadd.f32 %v2537_v29, %v2494_v25  ;;  %v2546_v21 = vmax.f32 %v2536_v34, 0.0 }
 0x2bb   :  { %v2539_v30 = vpop.f32.mrf.mxu1 }
 0x2bc   :  { %v2540_v32 = vadd.f32 %v2539_v30, %v2496_v28  ;;  %v2547_v38 = vmax.f32 %v2538_v31, 0.0 }
 0x2bd   :  { %v2541_v35 = vpop.f32.mrf.mxu1 }
 0x2be   :  { %v2542_v36 = vadd.f32 %v2541_v35, %v2498_v33  ;;  %v2550_v37 = vmax.f32 %v2540_v32, 0.0 }
 0x2c0   :  { %v2551_v13 = vmax.f32 %v2542_v36, 0.0  ;;  %v2554_v23 = vpack.c.bf16 %v2550_v37, %v2546_v21 }
 0x2c2   :  { %v2555_v39 = vpack.c.bf16 %v2551_v13, %v2547_v38 }
 0x2c4   :  { %2885 = vmatprep.mubr.bf16.mxu1 %v2555_v39 }
 0x2c5   :  { %2886 = vmatmul.mubr.bf16.vlgmr.msra.gmra.mxu1 %v2554_v23 }
 0x345   :  { %v3313_v26 = vpop.f32.mrf.mxu0 }
 0x347   :  { %v3314_v40 = vpop.f32.mrf.mxu0 }
 0x348   :  { %v3315_v46 = vadd.f32 %v3314_v40, %v3313_v26 }
 0x349   :  { %v3316_v42 = vpop.f32.mrf.mxu0 }
 0x34b   :  { %v3317_v12 = vpop.f32.mrf.mxu0 }
 0x34c   :  { %v3318_v51 = vadd.f32 %v3317_v12, %v3316_v42 }
 0x385   :  { %v3335_v43 = vpop.f32.mrf.mxu1 }
 0x387   :  { %v3336_v54 = vpop.f32.mrf.mxu1 }
 0x388   :  { %v3337_v47 = vadd.f32 %v3336_v54, %v3335_v43 }
 0x389   :  { %v3338_v48 = vpop.f32.mrf.mxu1 }
 0x38a   :  { %v2888_v49 = vadd.f32 %v3337_v47, %v3315_v46 }
 0x38b   :  { %v3339_v50 = vpop.f32.mrf.mxu1 }
 0x38c   :  { %v3340_v44 = vadd.f32 %v3339_v50, %v3338_v48  ;;  %v2897_v52 = vsel %vm2896_vm1, %v2888_v49, -1e+30 }
 0x38d   :  { %2899 = vmax.xlane.f32.xlu0 %v2897_v52 }
 0x38e   :  { %v2891_v53 = vadd.f32 %v3340_v44, %v3318_v51 }
 0x390   :  { %v2898_v55 = vsel %vm2896_vm1, %v2891_v53, -1e+30 }
 0x391   :  { %2901 = vmax.xlane.f32.xlu0 %v2898_v55 }
 0x416   :  { %v2900_v56 = vpop.xlane.xlu0 %2899 }
 0x417   :  { %v2903_v57 = vsub.f32 %v2897_v52, %v2900_v56 }
 0x419   :  { %v2905_v58 = vmul.f32 1.442695, %v2903_v57 }
 0x41a   :  { %v2902_v59 = vpop.xlane.xlu0 %2901 }
 0x41b   :  { %v2904_v60 = vsub.f32 %v2898_v55, %v2902_v59  ;;  %3869 = vpow2.f32 %v2905_v58 }
 0x41d   :  { %v2907_v61 = vmul.f32 1.442695, %v2904_v60 }
 0x41f   :  { %3871 = vpow2.f32 %v2907_v61 }
 0x428   :  { %v3870_v62 = vpop.eup %3869 }
 0x429   :  { %2909 = vadd.xlane.f32.xlu1 %v3870_v62 }
 0x42c   :  { %v3872_v63 = vpop.eup %3871 }
 0x42d   :  { %2911 = vadd.xlane.f32.xlu1 %v3872_v63 }
 0x4b2   :  { %v2910_v0 = vpop.xlane.xlu1 %2909 }
 0x4b3   :  { %3873 = vlog2.f32 %v2910_v0 }
 0x4b6   :  { %v2912_v1 = vpop.xlane.xlu1 %2911 }
 0x4b7   :  { %3875 = vlog2.f32 %v2912_v1 }
 0x4c0   :  { %v3874_v3 = vpop.eup %3873 }
 0x4c1   :  { %v2914_v4 = vmul.f32 0.6931472, %v3874_v3 }
 0x4c3   :  { %v2917_v5 = vsub.f32 %v2903_v57, %v2914_v4 }
 0x4c4   :  { %v3876_v6 = vpop.eup %3875 }
 0x4c5   :  { %2919 = vst [vmem:[#allocation7] sm:$0xff] %v2917_v5  ;;  %v2916_v7 = vmul.f32 0.6931472, %v3876_v6 }
 0x4c7   :  { %v2918_v2 = vsub.f32 %v2904_v60, %v2916_v7 }
 0x4c9   :  { %2920 = vst [vmem:[#allocation7 + $0x8] sm:$0xff] %v2918_v2 }
 0x4ca   :  { %3928 = shalt.err (!%p3925_p0)
}
 0x4cb   :  { %s3951_s26 = smov 128   ;;  %s3952_s27 = smov 8  }
 0x4cc   :  { %2932 = dma.vmem_to_hbm [thread:$0]  %s2927_s24, 256, %s4457_s4, [#allocation4], %s3951_s26, %s3951_s26, %s3952_s27  }
 0x4cd   :  { %3941 = dma.done.wait [#allocation4], 256  }
 0x4ce   :  { %3942 = vsyncadd [#allocation4], 4294967040 }
 0x4cf   :  { %2936 = vsyncpa [#allocation3], 1 }
 0x4d0   :  { %2937 = vsyncpa [#allocation6], 1 }
 0x4d1   :  { %2938 = vsyncpa [#allocation4], 1 }

</bundles_post_ra>
